<compile_context>
chip_gen: v5e
topology: v5e:2x2
jax: 0.10.0
libtpu: 0.0.40
codegen_flags: <defaults>
</compile_context>

<pallas_src>
import functools
import math

import jax
import jax.numpy as jnp
from jax.experimental import pallas as pl
from jax.experimental.pallas import tpu as pltpu


_VMEM_LIMIT = 48 * 1024 * 1024  # fits v5e/v6e (128 MiB) and v7x (64 MiB)


def _pick_tile(dim, target, align):
    """Largest aligned divisor of `dim` that is <= target (or full extent)."""
    if dim <= target:
        return dim
    t = (target // align) * align
    while t >= align:
        if dim % t == 0:
            return t
        t -= align
    return dim


# ----------------------------------------------------------------------------
# Fused (LayerNorm?) + matmul + bias (+relu) (+residual) kernel
# ----------------------------------------------------------------------------

def _fused_linear_kernel(*refs, fuse_ln, activation, add_residual, k_features):
    it = iter(refs)
    x_ref = next(it)
    if fuse_ln:
        g_ref = next(it)
        bb_ref = next(it)
    w_ref = next(it)
    bias_ref = next(it)
    res_ref = next(it) if add_residual else None
    o_ref = next(it)

    x = x_ref[...]                                    # (tm, K) f32
    if fuse_ln:
        # torch-style LayerNorm: a2*(x-mean)/(std+eps)+b2, std unbiased (ddof=1)
        mean = jnp.mean(x, axis=-1, keepdims=True)
        diff = x - mean
        var = jnp.sum(diff * diff, axis=-1, keepdims=True) / (k_features - 1)
        std = jnp.sqrt(var)
        x = g_ref[...] * diff * pl.reciprocal(std + 1e-6, approx=True) + bb_ref[...]

    y = jnp.dot(x.astype(jnp.bfloat16), w_ref[...],
                preferred_element_type=jnp.float32)   # bf16 MXU, f32 accum
    y = y + bias_ref[...]
    if activation == "relu":
        y = jnp.maximum(y, 0.0)
    if add_residual:
        y = y + res_ref[...]
    o_ref[...] = y.astype(o_ref.dtype)


def fused_linear(x2d, w, b, *, ln=None, residual=None, activation=None,
                 tm_target=256, tn_target=512):
    """y = (LN(x) if ln else x) @ w + b [+relu] [+residual].  w is bf16."""
    M, K = x2d.shape
    N = w.shape[1]
    tm = _pick_tile(M, tm_target, 8)
    tn = _pick_tile(N, tn_target, 128)
    grid = (M // tm, N // tn)

    in_specs = [pl.BlockSpec((tm, K), lambda i, j: (i, 0))]
    args = [x2d]
    if ln is not None:
        g, bb = ln
        in_specs += [pl.BlockSpec((1, K), lambda i, j: (0, 0)),
                     pl.BlockSpec((1, K), lambda i, j: (0, 0))]
        args += [g, bb]
    in_specs += [pl.BlockSpec((K, tn), lambda i, j: (0, j)),
                 pl.BlockSpec((1, tn), lambda i, j: (0, j))]
    args += [w, b]
    if residual is not None:
        in_specs.append(pl.BlockSpec((tm, tn), lambda i, j: (i, j)))
        args.append(residual)

    kern = functools.partial(_fused_linear_kernel,
                             fuse_ln=ln is not None,
                             activation=activation,
                             add_residual=residual is not None,
                             k_features=K)
    return pl.pallas_call(
        kern,
        out_shape=jax.ShapeDtypeStruct((M, N), jnp.float32),
        grid=grid,
        in_specs=in_specs,
        out_specs=pl.BlockSpec((tm, tn), lambda i, j: (i, j)),
        compiler_params=pltpu.CompilerParams(
            dimension_semantics=("parallel", "parallel"),
            vmem_limit_bytes=_VMEM_LIMIT),
    )(*args)


# ----------------------------------------------------------------------------
# LayerNorm kernel (final norm)
# ----------------------------------------------------------------------------

def _layernorm_kernel(x_ref, g_ref, b_ref, o_ref, *, k_features):
    x = x_ref[...]
    mean = jnp.mean(x, axis=-1, keepdims=True)
    diff = x - mean
    var = jnp.sum(diff * diff, axis=-1, keepdims=True) / (k_features - 1)
    std = jnp.sqrt(var)
    o_ref[...] = (g_ref[...] * diff * pl.reciprocal(std + 1e-6, approx=True)
                  + b_ref[...]).astype(o_ref.dtype)


def layernorm(x, gamma, beta, tm_target=256):
    B, T, D = x.shape
    M = B * T
    tm = _pick_tile(M, tm_target, 8)
    out = pl.pallas_call(
        functools.partial(_layernorm_kernel, k_features=D),
        out_shape=jax.ShapeDtypeStruct((M, D), jnp.float32),
        grid=(M // tm,),
        in_specs=[pl.BlockSpec((tm, D), lambda i: (i, 0)),
                  pl.BlockSpec((1, D), lambda i: (0, 0)),
                  pl.BlockSpec((1, D), lambda i: (0, 0))],
        out_specs=pl.BlockSpec((tm, D), lambda i: (i, 0)),
        compiler_params=pltpu.CompilerParams(
            dimension_semantics=("parallel",),
            vmem_limit_bytes=_VMEM_LIMIT),
    )(x.reshape(M, D), gamma, beta)
    return out.reshape(B, T, D)


# ----------------------------------------------------------------------------
# Attention kernels (heads split in-kernel; RoPE fused; bf16 MXU inputs)
# ----------------------------------------------------------------------------

def _rope_rotate(x, cos, sin):
    # x: (L, dk), cos/sin: (L, dk); rotate-half RoPE
    half = x.shape[-1] // 2
    x1 = x[:, :half]
    x2 = x[:, half:]
    rot = jnp.concatenate([-x2, x1], axis=-1)
    return x * cos + rot * sin


def _attend_heads(q2d, k2d, v2d, mask, n_heads, dk, cos=None, sin=None):
    """q2d:(T,D) k2d/v2d:(S,D) packed heads; returns (T,D)."""
    scale = 1.0 / math.sqrt(dk)
    outs = []
    for h in range(n_heads):
        qh = q2d[:, h * dk:(h + 1) * dk]
        kh = k2d[:, h * dk:(h + 1) * dk]
        vh = v2d[:, h * dk:(h + 1) * dk]
        if cos is not None:
            qh = _rope_rotate(qh, cos, sin)
            kh = _rope_rotate(kh, cos, sin)
        qh = qh * scale                                           # fold 1/sqrt(dk)
        s = jax.lax.dot_general(
            qh.astype(jnp.bfloat16), kh.astype(jnp.bfloat16),
            (((1,), (1,)), ((), ())),
            preferred_element_type=jnp.float32)                   # (T, S)
        s = jnp.where(mask == 0.0, jnp.float32(-1e9), s)          # masked_fill
        s = s - jnp.max(s, axis=-1, keepdims=True)
        p = jnp.exp(s)
        p = p * pl.reciprocal(jnp.sum(p, axis=-1, keepdims=True), approx=True)
        o = jnp.dot(p.astype(jnp.bfloat16), vh.astype(jnp.bfloat16),
                    preferred_element_type=jnp.float32)           # (T, dk)
        outs.append(o)
    return jnp.concatenate(outs, axis=-1)                         # (T, D)


def _self_attn_kernel(*refs, n_heads, use_rope):
    if use_rope:
        qkv_ref, mask_ref, cos_ref, sin_ref, o_ref = refs
        cos, sin = cos_ref[...], sin_ref[...]
    else:
        qkv_ref, mask_ref, o_ref = refs
        cos = sin = None
    D3 = qkv_ref.shape[-1]
    D = D3 // 3
    dk = D // n_heads
    qkv = qkv_ref[0]                                  # (T, 3D)
    mask = mask_ref[0]                                # (T, T)
    o = _attend_heads(qkv[:, :D], qkv[:, D:2 * D], qkv[:, 2 * D:],
                      mask, n_heads, dk, cos, sin)
    o_ref[0] = o.astype(o_ref.dtype)


def _cross_attn_kernel(q_ref, kv_ref, mask_ref, o_ref, *, n_heads):
    D = q_ref.shape[-1]
    dk = D // n_heads
    q = q_ref[0]                                      # (T, D)
    kv = kv_ref[0]                                    # (S, 2D)
    mask = mask_ref[0]                                # (T, S)
    o = _attend_heads(q, kv[:, :D], kv[:, D:], mask, n_heads, dk)
    o_ref[0] = o.astype(o_ref.dtype)


def self_attention(qkv, mask, cos, sin, n_heads, use_rope):
    B, T, D3 = qkv.shape
    D = D3 // 3
    dk = D // n_heads
    S = mask.shape[-1]
    in_specs = [pl.BlockSpec((1, T, D3), lambda b: (b, 0, 0)),
                pl.BlockSpec((1, T, S), lambda b: (b, 0, 0))]
    args = [qkv, mask]
    if use_rope:
        in_specs += [pl.BlockSpec((T, dk), lambda b: (0, 0)),
                     pl.BlockSpec((T, dk), lambda b: (0, 0))]
        args += [cos, sin]
    kern = functools.partial(_self_attn_kernel, n_heads=n_heads, use_rope=use_rope)
    return pl.pallas_call(
        kern,
        out_shape=jax.ShapeDtypeStruct((B, T, D), jnp.float32),
        grid=(B,),
        in_specs=in_specs,
        out_specs=pl.BlockSpec((1, T, D), lambda b: (b, 0, 0)),
        compiler_params=pltpu.CompilerParams(
            dimension_semantics=("parallel",),
            vmem_limit_bytes=_VMEM_LIMIT),
    )(*args)


def cross_attention(q, kv, mask, n_heads):
    B, T, D = q.shape
    S = kv.shape[1]
    kern = functools.partial(_cross_attn_kernel, n_heads=n_heads)
    return pl.pallas_call(
        kern,
        out_shape=jax.ShapeDtypeStruct((B, T, D), jnp.float32),
        grid=(B,),
        in_specs=[pl.BlockSpec((1, T, D), lambda b: (b, 0, 0)),
                  pl.BlockSpec((1, S, 2 * D), lambda b: (b, 0, 0)),
                  pl.BlockSpec((1, T, S), lambda b: (b, 0, 0))],
        out_specs=pl.BlockSpec((1, T, D), lambda b: (b, 0, 0)),
        compiler_params=pltpu.CompilerParams(
            dimension_semantics=("parallel",),
            vmem_limit_bytes=_VMEM_LIMIT),
    )(q, kv, mask)


# ----------------------------------------------------------------------------
# Glue (embedding gather, RoPE tables, residual wiring)
# ----------------------------------------------------------------------------

def get_pe(d_model, max_len=5000):
    position = jnp.arange(max_len, dtype=jnp.float32)[:, None]
    div_term = jnp.exp(jnp.arange(0, d_model, 2, dtype=jnp.float32)
                       * -(math.log(10000.0) / d_model))
    pe = jnp.zeros((max_len, d_model), jnp.float32)
    pe = pe.at[:, 0::2].set(jnp.sin(position * div_term))
    pe = pe.at[:, 1::2].set(jnp.cos(position * div_term))
    return pe[None]  # (1, max_len, d_model)


def rope_tables(positions, dk):
    half = dk // 2
    inv_freq = 1.0 / (10000.0 ** (jnp.arange(half, dtype=jnp.float32) / half))
    ang = positions.astype(jnp.float32)[:, None] * inv_freq[None, :]   # (L, half)
    cos = jnp.concatenate([jnp.cos(ang), jnp.cos(ang)], axis=-1)       # (L, dk)
    sin = jnp.concatenate([jnp.sin(ang), jnp.sin(ang)], axis=-1)
    return cos, sin


def decoder_layer(x, m, y_mask, m_mask, p, n_heads, use_rope, rope_q):
    B, T, D = x.shape
    S = m.shape[1]
    xf = x.reshape(B * T, D)

    # --- self-attention sublayer: x + Wo(Attn(RoPE(LN1(x) Wqkv))) ---
    qkv = fused_linear(xf, p["sa"]["w_qkv"], p["sa"]["b_qkv"],
                       ln=(p["ln1_g"], p["ln1_b"])).reshape(B, T, 3 * D)
    a = self_attention(qkv, y_mask, rope_q[0], rope_q[1], n_heads, use_rope)
    xf = fused_linear(a.reshape(B * T, D), p["sa"]["wo"], p["sa"]["bo"],
                      residual=xf)

    # --- cross-attention sublayer: x + Wo(Attn(LN2(x) Wq, m Wkv)) ---
    # TODO(synk): RoPE is applied to self-attention only; the reference
    # DecoderLayerForConditionalLLM source was not provided for cross-attention.
    q = fused_linear(xf, p["ca"]["wq"], p["ca"]["bq"],
                     ln=(p["ln2_g"], p["ln2_b"])).reshape(B, T, D)
    kv = fused_linear(m.reshape(B * S, D), p["ca"]["w_kv"],
                      p["ca"]["b_kv"]).reshape(B, S, 2 * D)
    a = cross_attention(q, kv, m_mask, n_heads)
    xf = fused_linear(a.reshape(B * T, D), p["ca"]["wo"], p["ca"]["bo"],
                      residual=xf)

    # --- FFN sublayer: x + W2 relu(LN3(x) W1) ---
    h = fused_linear(xf, p["ff"]["w1"], p["ff"]["b1"],
                     ln=(p["ln3_g"], p["ln3_b"]), activation="relu")
    xf = fused_linear(h, p["ff"]["w2"], p["ff"]["b2"], residual=xf)
    return xf.reshape(B, T, D)


def decoder_forward(params, y, m, y_mask, m_mask, *, n_heads, use_rope=True):
    d = params["embed"].shape[1]
    x = jnp.take(params["embed"], y, axis=0) * math.sqrt(d)   # Embed: lut(y)*sqrt(d)
    if not use_rope:
        x = x + params["pe"][:, : x.shape[1]]
    T = y.shape[1]
    dk = d // n_heads
    rope_q = rope_tables(jnp.arange(T), dk) if use_rope else (None, None)
    for lp in params["layers"]:
        x = decoder_layer(x, m, y_mask, m_mask, lp, n_heads, use_rope, rope_q)
    return layernorm(x, params["norm_g"], params["norm_b"])


# ----------------------------------------------------------------------------
# Deterministic parameter initialization (synthetic, no checkpoint)
# ----------------------------------------------------------------------------

def init_params(key, vocab_n, num_layers, d, d_ff, use_rope, max_len):
    keys = iter(jax.random.split(key, 4 + num_layers * 16))

    def w(shape, scale=0.02, dtype=jnp.bfloat16):
        return (scale * jax.random.normal(next(keys), shape)).astype(dtype)

    def zeros(n):
        return jnp.zeros((1, n), jnp.float32)

    layers = []
    for _ in range(num_layers):
        layers.append({
            "ln1_g": jnp.ones((1, d), jnp.float32), "ln1_b": zeros(d),
            "ln2_g": jnp.ones((1, d), jnp.float32), "ln2_b": zeros(d),
            "ln3_g": jnp.ones((1, d), jnp.float32), "ln3_b": zeros(d),
            "sa": {  # fused q,k,v projection
                "w_qkv": w((d, 3 * d)), "b_qkv": zeros(3 * d),
                "wo": w((d, d)), "bo": zeros(d),
            },
            "ca": {  # separate q; fused k,v projection of memory
                "wq": w((d, d)), "bq": zeros(d),
                "w_kv": w((d, 2 * d)), "b_kv": zeros(2 * d),
                "wo": w((d, d)), "bo": zeros(d),
            },
            "ff": {
                "w1": w((d, d_ff)), "b1": zeros(d_ff),
                "w2": w((d_ff, d)), "b2": zeros(d),
            },
        })

    params = {
        "embed": w((vocab_n, d), scale=1.0, dtype=jnp.float32),
        "layers": layers,
        "norm_g": jnp.ones((1, d), jnp.float32),
        "norm_b": zeros(d),
    }
    if not use_rope:
        params["pe"] = get_pe(d, max_len=max(max_len, 5000))
    return params


# ----------------------------------------------------------------------------

if __name__ == "__main__":
    # Small, module-consistent shapes.
    vocab_n, num_layers, d, n_heads, max_len, d_ff = 50, 2, 32, 4, 64, 64
    B, T, S = 2, 8, 8
    use_rope = True

    key = jax.random.PRNGKey(0)
    k_param, k_tok, k_mem = jax.random.split(key, 3)

    params = init_params(k_param, vocab_n, num_layers, d, d_ff, use_rope, max_len)

    y = jax.random.randint(k_tok, (B, T), 0, vocab_n, dtype=jnp.int32)
    m = jax.random.normal(k_mem, (B, S, d), dtype=jnp.float32)
    # Causal mask for the target sequence, full visibility over memory.
    y_mask = jnp.tril(jnp.ones((T, T), jnp.float32))[None].repeat(B, axis=0)
    m_mask = jnp.ones((B, T, S), jnp.float32)

    fwd = jax.jit(functools.partial(decoder_forward, n_heads=n_heads,
                                    use_rope=use_rope))
    out = fwd(params, y, m, y_mask, m_mask)
    out = jax.block_until_ready(out)
    assert out.shape == (B, T, d)
    assert bool(jnp.all(jnp.isfinite(out)))
    print("KERNEL_OK")
</pallas_src>

<mosaic_0001>
module attributes {stable_mosaic.version = 11 : i64} {
  func.func @_fused_linear_kernel(%arg0: i32, %arg1: i32, %arg2: memref<16x32xf32, #tpu.memory_space<vmem>>, %arg3: memref<1x32xf32, #tpu.memory_space<vmem>>, %arg4: memref<1x32xf32, #tpu.memory_space<vmem>>, %arg5: memref<32x96xbf16, #tpu.memory_space<vmem>>, %arg6: memref<1x96xf32, #tpu.memory_space<vmem>>, %arg7: memref<16x96xf32, #tpu.memory_space<vmem>>) attributes {dimension_semantics = [#tpu.dimension_semantics<parallel>, #tpu.dimension_semantics<parallel>], iteration_bounds = array<i64: 1, 1>, scalar_prefetch = 0 : i64, scratch_operands = 0 : i64, tpu.core_type = #tpu.core_type<tc>, window_params = [{transform_indices = @transform_0, window_bounds = array<i64: 16, 32>}, {pipeline_mode = #tpu.pipeline_mode<synchronous>, transform_indices = @transform_1, window_bounds = array<i64: 1, 32>}, {pipeline_mode = #tpu.pipeline_mode<synchronous>, transform_indices = @transform_2, window_bounds = array<i64: 1, 32>}, {transform_indices = @transform_3, window_bounds = array<i64: 32, 96>}, {transform_indices = @transform_4, window_bounds = array<i64: 1, 96>}, {transform_indices = @transform_5, window_bounds = array<i64: 16, 96>}]} {
    %c0 = arith.constant 0 : index
    %c0_0 = arith.constant 0 : index
    %0 = vector.load %arg2[%c0, %c0_0] : memref<16x32xf32, #tpu.memory_space<vmem>>, vector<16x32xf32>
    %cst = arith.constant dense<0.000000e+00> : vector<16xf32>
    %1 = vector.multi_reduction <add>, %0, %cst [1] : vector<16x32xf32> to vector<16xf32>
    %2 = vector.shape_cast %1 : vector<16xf32> to vector<16x1xf32>
    %cst_1 = arith.constant 3.200000e+01 : f32
    %3 = vector.broadcast %cst_1 : f32 to vector<16x1xf32>
    %4 = arith.divf %2, %3 : vector<16x1xf32>
    %5 = vector.broadcast %4 : vector<16x1xf32> to vector<16x32xf32>
    %6 = arith.subf %0, %5 : vector<16x32xf32>
    %7 = arith.mulf %6, %6 : vector<16x32xf32>
    %cst_2 = arith.constant dense<0.000000e+00> : vector<16xf32>
    %8 = vector.multi_reduction <add>, %7, %cst_2 [1] : vector<16x32xf32> to vector<16xf32>
    %9 = vector.shape_cast %8 : vector<16xf32> to vector<16x1xf32>
    %cst_3 = arith.constant 3.100000e+01 : f32
    %10 = vector.broadcast %cst_3 : f32 to vector<16x1xf32>
    %11 = arith.divf %9, %10 : vector<16x1xf32>
    %12 = math.sqrt %11 : vector<16x1xf32>
    %c0_4 = arith.constant 0 : index
    %c0_5 = arith.constant 0 : index
    %13 = vector.load %arg3[%c0_4, %c0_5] : memref<1x32xf32, #tpu.memory_space<vmem>>, vector<1x32xf32>
    %14 = vector.broadcast %13 : vector<1x32xf32> to vector<16x32xf32>
    %15 = arith.mulf %14, %6 : vector<16x32xf32>
    %cst_6 = arith.constant 9.99999997E-7 : f32
    %16 = vector.broadcast %cst_6 : f32 to vector<16x1xf32>
    %17 = arith.addf %12, %16 : vector<16x1xf32>
    %18 = tpu.reciprocal %17 {approx = true} : vector<16x1xf32> -> vector<16x1xf32>
    %19 = vector.broadcast %18 : vector<16x1xf32> to vector<16x32xf32>
    %20 = arith.mulf %15, %19 : vector<16x32xf32>
    %c0_7 = arith.constant 0 : index
    %c0_8 = arith.constant 0 : index
    %21 = vector.load %arg4[%c0_7, %c0_8] : memref<1x32xf32, #tpu.memory_space<vmem>>, vector<1x32xf32>
    %22 = vector.broadcast %21 : vector<1x32xf32> to vector<16x32xf32>
    %23 = arith.addf %20, %22 : vector<16x32xf32>
    %24 = arith.truncf %23 : vector<16x32xf32> to vector<16x32xbf16>
    %c0_9 = arith.constant 0 : index
    %c0_10 = arith.constant 0 : index
    %25 = vector.load %arg5[%c0_9, %c0_10] : memref<32x96xbf16, #tpu.memory_space<vmem>>, vector<32x96xbf16>
    %cst_11 = arith.constant dense<0.000000e+00> : vector<16x96xf32>
    %26 = tpu.matmul %24, %25, %cst_11 {dimension_numbers = #tpu.dot_dimension_numbers<[1], [0], [0], [1], [0, 0, 1, 1], [], []>} : vector<16x32xbf16>, vector<32x96xbf16>, vector<16x96xf32> -> vector<16x96xf32>
    %c0_12 = arith.constant 0 : index
    %c0_13 = arith.constant 0 : index
    %27 = vector.load %arg6[%c0_12, %c0_13] : memref<1x96xf32, #tpu.memory_space<vmem>>, vector<1x96xf32>
    %28 = vector.broadcast %27 : vector<1x96xf32> to vector<16x96xf32>
    %29 = arith.addf %26, %28 : vector<16x96xf32>
    %c0_14 = arith.constant 0 : index
    %c0_15 = arith.constant 0 : index
    %30 = vector.load %arg7[%c0_14, %c0_15] : memref<16x96xf32, #tpu.memory_space<vmem>>, vector<16x96xf32>
    tpu.vector_store %arg7[%c0_14, %c0_15], %29 {strides = array<i32>} : memref<16x96xf32, #tpu.memory_space<vmem>>, vector<16x96xf32>,
    return
  }
  func.func @transform_0(%arg0: i32, %arg1: i32) -> (i32, i32) {
    %c0_i32 = arith.constant 0 : i32
    %c0_i32_0 = arith.constant 0 : i32
    return %arg0, %c0_i32 : i32, i32
  }
  func.func @transform_1(%arg0: i32, %arg1: i32) -> (i32, i32) {
    %c0_i32 = arith.constant 0 : i32
    %c0_i32_0 = arith.constant 0 : i32
    %c0_i32_1 = arith.constant 0 : i32
    return %c0_i32, %c0_i32_0 : i32, i32
  }
  func.func @transform_2(%arg0: i32, %arg1: i32) -> (i32, i32) {
    %c0_i32 = arith.constant 0 : i32
    %c0_i32_0 = arith.constant 0 : i32
    %c0_i32_1 = arith.constant 0 : i32
    return %c0_i32, %c0_i32_0 : i32, i32
  }
  func.func @transform_3(%arg0: i32, %arg1: i32) -> (i32, i32) {
    %c0_i32 = arith.constant 0 : i32
    %c0_i32_0 = arith.constant 0 : i32
    return %c0_i32, %arg1 : i32, i32
  }
  func.func @transform_4(%arg0: i32, %arg1: i32) -> (i32, i32) {
    %c0_i32 = arith.constant 0 : i32
    %c0_i32_0 = arith.constant 0 : i32
    return %c0_i32, %arg1 : i32, i32
  }
  func.func @transform_5(%arg0: i32, %arg1: i32) -> (i32, i32) {
    %c0_i32 = arith.constant 0 : i32
    return %arg0, %arg1 : i32, i32
  }
}

module attributes {stable_mosaic.version = 11 : i64} {
  func.func @_fused_linear_kernel(%arg0: i32, %arg1: i32, %arg2: memref<16x32xf32, #tpu.memory_space<vmem>>, %arg3: memref<32x32xbf16, #tpu.memory_space<vmem>>, %arg4: memref<1x32xf32, #tpu.memory_space<vmem>>, %arg5: memref<16x32xf32, #tpu.memory_space<vmem>>, %arg6: memref<16x32xf32, #tpu.memory_space<vmem>>) attributes {dimension_semantics = [#tpu.dimension_semantics<parallel>, #tpu.dimension_semantics<parallel>], iteration_bounds = array<i64: 1, 1>, scalar_prefetch = 0 : i64, scratch_operands = 0 : i64, tpu.core_type = #tpu.core_type<tc>, window_params = [{transform_indices = @transform_0, window_bounds = array<i64: 16, 32>}, {transform_indices = @transform_1, window_bounds = array<i64: 32, 32>}, {transform_indices = @transform_2, window_bounds = array<i64: 1, 32>}, {transform_indices = @transform_3, window_bounds = array<i64: 16, 32>}, {transform_indices = @transform_4, window_bounds = array<i64: 16, 32>}]} {
    %c0 = arith.constant 0 : index
    %c0_0 = arith.constant 0 : index
    %0 = vector.load %arg2[%c0, %c0_0] : memref<16x32xf32, #tpu.memory_space<vmem>>, vector<16x32xf32>
    %1 = arith.truncf %0 : vector<16x32xf32> to vector<16x32xbf16>
    %c0_1 = arith.constant 0 : index
    %c0_2 = arith.constant 0 : index
    %2 = vector.load %arg3[%c0_1, %c0_2] : memref<32x32xbf16, #tpu.memory_space<vmem>>, vector<32x32xbf16>
    %cst = arith.constant dense<0.000000e+00> : vector<16x32xf32>
    %3 = tpu.matmul %1, %2, %cst {dimension_numbers = #tpu.dot_dimension_numbers<[1], [0], [0], [1], [0, 0, 1, 1], [], []>} : vector<16x32xbf16>, vector<32x32xbf16>, vector<16x32xf32> -> vector<16x32xf32>
    %c0_3 = arith.constant 0 : index
    %c0_4 = arith.constant 0 : index
    %4 = vector.load %arg4[%c0_3, %c0_4] : memref<1x32xf32, #tpu.memory_space<vmem>>, vector<1x32xf32>
    %5 = vector.broadcast %4 : vector<1x32xf32> to vector<16x32xf32>
    %6 = arith.addf %3, %5 : vector<16x32xf32>
    %c0_5 = arith.constant 0 : index
    %c0_6 = arith.constant 0 : index
    %7 = vector.load %arg5[%c0_5, %c0_6] : memref<16x32xf32, #tpu.memory_space<vmem>>, vector<16x32xf32>
    %8 = arith.addf %6, %7 : vector<16x32xf32>
    %c0_7 = arith.constant 0 : index
    %c0_8 = arith.constant 0 : index
    %9 = vector.load %arg6[%c0_7, %c0_8] : memref<16x32xf32, #tpu.memory_space<vmem>>, vector<16x32xf32>
    tpu.vector_store %arg6[%c0_7, %c0_8], %8 {strides = array<i32>} : memref<16x32xf32, #tpu.memory_space<vmem>>, vector<16x32xf32>,
    return
  }
  func.func @transform_0(%arg0: i32, %arg1: i32) -> (i32, i32) {
    %c0_i32 = arith.constant 0 : i32
    %c0_i32_0 = arith.constant 0 : i32
    return %arg0, %c0_i32 : i32, i32
  }
  func.func @transform_1(%arg0: i32, %arg1: i32) -> (i32, i32) {
    %c0_i32 = arith.constant 0 : i32
    %c0_i32_0 = arith.constant 0 : i32
    return %c0_i32, %arg1 : i32, i32
  }
  func.func @transform_2(%arg0: i32, %arg1: i32) -> (i32, i32) {
    %c0_i32 = arith.constant 0 : i32
    %c0_i32_0 = arith.constant 0 : i32
    return %c0_i32, %arg1 : i32, i32
  }
  func.func @transform_3(%arg0: i32, %arg1: i32) -> (i32, i32) {
    %c0_i32 = arith.constant 0 : i32
    return %arg0, %arg1 : i32, i32
  }
  func.func @transform_4(%arg0: i32, %arg1: i32) -> (i32, i32) {
    %c0_i32 = arith.constant 0 : i32
    return %arg0, %arg1 : i32, i32
  }
}

module attributes {stable_mosaic.version = 11 : i64} {
  func.func @_fused_linear_kernel(%arg0: i32, %arg1: i32, %arg2: memref<16x32xf32, #tpu.memory_space<vmem>>, %arg3: memref<1x32xf32, #tpu.memory_space<vmem>>, %arg4: memref<1x32xf32, #tpu.memory_space<vmem>>, %arg5: memref<32x32xbf16, #tpu.memory_space<vmem>>, %arg6: memref<1x32xf32, #tpu.memory_space<vmem>>, %arg7: memref<16x32xf32, #tpu.memory_space<vmem>>) attributes {dimension_semantics = [#tpu.dimension_semantics<parallel>, #tpu.dimension_semantics<parallel>], iteration_bounds = array<i64: 1, 1>, scalar_prefetch = 0 : i64, scratch_operands = 0 : i64, tpu.core_type = #tpu.core_type<tc>, window_params = [{transform_indices = @transform_0, window_bounds = array<i64: 16, 32>}, {pipeline_mode = #tpu.pipeline_mode<synchronous>, transform_indices = @transform_1, window_bounds = array<i64: 1, 32>}, {pipeline_mode = #tpu.pipeline_mode<synchronous>, transform_indices = @transform_2, window_bounds = array<i64: 1, 32>}, {transform_indices = @transform_3, window_bounds = array<i64: 32, 32>}, {transform_indices = @transform_4, window_bounds = array<i64: 1, 32>}, {transform_indices = @transform_5, window_bounds = array<i64: 16, 32>}]} {
    %c0 = arith.constant 0 : index
    %c0_0 = arith.constant 0 : index
    %0 = vector.load %arg2[%c0, %c0_0] : memref<16x32xf32, #tpu.memory_space<vmem>>, vector<16x32xf32>
    %cst = arith.constant dense<0.000000e+00> : vector<16xf32>
    %1 = vector.multi_reduction <add>, %0, %cst [1] : vector<16x32xf32> to vector<16xf32>
    %2 = vector.shape_cast %1 : vector<16xf32> to vector<16x1xf32>
    %cst_1 = arith.constant 3.200000e+01 : f32
    %3 = vector.broadcast %cst_1 : f32 to vector<16x1xf32>
    %4 = arith.divf %2, %3 : vector<16x1xf32>
    %5 = vector.broadcast %4 : vector<16x1xf32> to vector<16x32xf32>
    %6 = arith.subf %0, %5 : vector<16x32xf32>
    %7 = arith.mulf %6, %6 : vector<16x32xf32>
    %cst_2 = arith.constant dense<0.000000e+00> : vector<16xf32>
    %8 = vector.multi_reduction <add>, %7, %cst_2 [1] : vector<16x32xf32> to vector<16xf32>
    %9 = vector.shape_cast %8 : vector<16xf32> to vector<16x1xf32>
    %cst_3 = arith.constant 3.100000e+01 : f32
    %10 = vector.broadcast %cst_3 : f32 to vector<16x1xf32>
    %11 = arith.divf %9, %10 : vector<16x1xf32>
    %12 = math.sqrt %11 : vector<16x1xf32>
    %c0_4 = arith.constant 0 : index
    %c0_5 = arith.constant 0 : index
    %13 = vector.load %arg3[%c0_4, %c0_5] : memref<1x32xf32, #tpu.memory_space<vmem>>, vector<1x32xf32>
    %14 = vector.broadcast %13 : vector<1x32xf32> to vector<16x32xf32>
    %15 = arith.mulf %14, %6 : vector<16x32xf32>
    %cst_6 = arith.constant 9.99999997E-7 : f32
    %16 = vector.broadcast %cst_6 : f32 to vector<16x1xf32>
    %17 = arith.addf %12, %16 : vector<16x1xf32>
    %18 = tpu.reciprocal %17 {approx = true} : vector<16x1xf32> -> vector<16x1xf32>
    %19 = vector.broadcast %18 : vector<16x1xf32> to vector<16x32xf32>
    %20 = arith.mulf %15, %19 : vector<16x32xf32>
    %c0_7 = arith.constant 0 : index
    %c0_8 = arith.constant 0 : index
    %21 = vector.load %arg4[%c0_7, %c0_8] : memref<1x32xf32, #tpu.memory_space<vmem>>, vector<1x32xf32>
    %22 = vector.broadcast %21 : vector<1x32xf32> to vector<16x32xf32>
    %23 = arith.addf %20, %22 : vector<16x32xf32>
    %24 = arith.truncf %23 : vector<16x32xf32> to vector<16x32xbf16>
    %c0_9 = arith.constant 0 : index
    %c0_10 = arith.constant 0 : index
    %25 = vector.load %arg5[%c0_9, %c0_10] : memref<32x32xbf16, #tpu.memory_space<vmem>>, vector<32x32xbf16>
    %cst_11 = arith.constant dense<0.000000e+00> : vector<16x32xf32>
    %26 = tpu.matmul %24, %25, %cst_11 {dimension_numbers = #tpu.dot_dimension_numbers<[1], [0], [0], [1], [0, 0, 1, 1], [], []>} : vector<16x32xbf16>, vector<32x32xbf16>, vector<16x32xf32> -> vector<16x32xf32>
    %c0_12 = arith.constant 0 : index
    %c0_13 = arith.constant 0 : index
    %27 = vector.load %arg6[%c0_12, %c0_13] : memref<1x32xf32, #tpu.memory_space<vmem>>, vector<1x32xf32>
    %28 = vector.broadcast %27 : vector<1x32xf32> to vector<16x32xf32>
    %29 = arith.addf %26, %28 : vector<16x32xf32>
    %c0_14 = arith.constant 0 : index
    %c0_15 = arith.constant 0 : index
    %30 = vector.load %arg7[%c0_14, %c0_15] : memref<16x32xf32, #tpu.memory_space<vmem>>, vector<16x32xf32>
    tpu.vector_store %arg7[%c0_14, %c0_15], %29 {strides = array<i32>} : memref<16x32xf32, #tpu.memory_space<vmem>>, vector<16x32xf32>,
    return
  }
  func.func @transform_0(%arg0: i32, %arg1: i32) -> (i32, i32) {
    %c0_i32 = arith.constant 0 : i32
    %c0_i32_0 = arith.constant 0 : i32
    return %arg0, %c0_i32 : i32, i32
  }
  func.func @transform_1(%arg0: i32, %arg1: i32) -> (i32, i32) {
    %c0_i32 = arith.constant 0 : i32
    %c0_i32_0 = arith.constant 0 : i32
    %c0_i32_1 = arith.constant 0 : i32
    return %c0_i32, %c0_i32_0 : i32, i32
  }
  func.func @transform_2(%arg0: i32, %arg1: i32) -> (i32, i32) {
    %c0_i32 = arith.constant 0 : i32
    %c0_i32_0 = arith.constant 0 : i32
    %c0_i32_1 = arith.constant 0 : i32
    return %c0_i32, %c0_i32_0 : i32, i32
  }
  func.func @transform_3(%arg0: i32, %arg1: i32) -> (i32, i32) {
    %c0_i32 = arith.constant 0 : i32
    %c0_i32_0 = arith.constant 0 : i32
    return %c0_i32, %arg1 : i32, i32
  }
  func.func @transform_4(%arg0: i32, %arg1: i32) -> (i32, i32) {
    %c0_i32 = arith.constant 0 : i32
    %c0_i32_0 = arith.constant 0 : i32
    return %c0_i32, %arg1 : i32, i32
  }
  func.func @transform_5(%arg0: i32, %arg1: i32) -> (i32, i32) {
    %c0_i32 = arith.constant 0 : i32
    return %arg0, %arg1 : i32, i32
  }
}

module attributes {stable_mosaic.version = 11 : i64} {
  func.func @_self_attn_kernel(%arg0: i32, %arg1: memref<1x8x96xf32, #tpu.memory_space<vmem>>, %arg2: memref<1x8x8xf32, #tpu.memory_space<vmem>>, %arg3: memref<8x8xf32, #tpu.memory_space<vmem>>, %arg4: memref<8x8xf32, #tpu.memory_space<vmem>>, %arg5: memref<1x8x32xf32, #tpu.memory_space<vmem>>) attributes {dimension_semantics = [#tpu.dimension_semantics<parallel>], iteration_bounds = array<i64: 2>, scalar_prefetch = 0 : i64, scratch_operands = 0 : i64, tpu.core_type = #tpu.core_type<tc>, window_params = [{transform_indices = @transform_0, window_bounds = array<i64: 1, 8, 96>}, {transform_indices = @transform_1, window_bounds = array<i64: 1, 8, 8>}, {pipeline_mode = #tpu.pipeline_mode<synchronous>, transform_indices = @transform_2, window_bounds = array<i64: 8, 8>}, {pipeline_mode = #tpu.pipeline_mode<synchronous>, transform_indices = @transform_3, window_bounds = array<i64: 8, 8>}, {transform_indices = @transform_4, window_bounds = array<i64: 1, 8, 32>}]} {
    %c0 = arith.constant 0 : index
    %c0_0 = arith.constant 0 : index
    %0 = vector.load %arg3[%c0, %c0_0] : memref<8x8xf32, #tpu.memory_space<vmem>>, vector<8x8xf32>
    %c0_1 = arith.constant 0 : index
    %c0_2 = arith.constant 0 : index
    %1 = vector.load %arg4[%c0_1, %c0_2] : memref<8x8xf32, #tpu.memory_space<vmem>>, vector<8x8xf32>
    %c0_3 = arith.constant 0 : index
    %c0_4 = arith.constant 0 : index
    %c0_5 = arith.constant 0 : index
    %2 = vector.load %arg1[%c0_3, %c0_4, %c0_5] : memref<1x8x96xf32, #tpu.memory_space<vmem>>, vector<1x8x96xf32>
    %3 = vector.shape_cast %2 : vector<1x8x96xf32> to vector<8x96xf32>
    %c0_6 = arith.constant 0 : index
    %c0_7 = arith.constant 0 : index
    %c0_8 = arith.constant 0 : index
    %4 = vector.load %arg2[%c0_6, %c0_7, %c0_8] : memref<1x8x8xf32, #tpu.memory_space<vmem>>, vector<1x8x8xf32>
    %5 = vector.shape_cast %4 : vector<1x8x8xf32> to vector<8x8xf32>
    %6 = vector.extract_strided_slice %3 {offsets = [0, 0], sizes = [8, 32], strides = [1, 1]} : vector<8x96xf32> to vector<8x32xf32>
    %7 = vector.extract_strided_slice %3 {offsets = [0, 32], sizes = [8, 32], strides = [1, 1]} : vector<8x96xf32> to vector<8x32xf32>
    %8 = vector.extract_strided_slice %3 {offsets = [0, 64], sizes = [8, 32], strides = [1, 1]} : vector<8x96xf32> to vector<8x32xf32>
    %9 = vector.extract_strided_slice %6 {offsets = [0, 0], sizes = [8, 8], strides = [1, 1]} : vector<8x32xf32> to vector<8x8xf32>
    %10 = vector.extract_strided_slice %7 {offsets = [0, 0], sizes = [8, 8], strides = [1, 1]} : vector<8x32xf32> to vector<8x8xf32>
    %11 = vector.extract_strided_slice %8 {offsets = [0, 0], sizes = [8, 8], strides = [1, 1]} : vector<8x32xf32> to vector<8x8xf32>
    %12 = vector.extract_strided_slice %9 {offsets = [0, 0], sizes = [8, 4], strides = [1, 1]} : vector<8x8xf32> to vector<8x4xf32>
    %13 = vector.extract_strided_slice %9 {offsets = [0, 4], sizes = [8, 4], strides = [1, 1]} : vector<8x8xf32> to vector<8x4xf32>
    %cst = arith.constant 0.000000e+00 : f32
    %14 = vector.broadcast %cst : f32 to vector<8x4xf32>
    %15 = arith.subf %14, %13 : vector<8x4xf32>
    %16 = tpu.concatenate %15, %12 in 1 : vector<8x4xf32>, vector<8x4xf32> -> vector<8x8xf32>
    %17 = arith.mulf %9, %0 : vector<8x8xf32>
    %18 = arith.mulf %16, %1 : vector<8x8xf32>
    %19 = arith.addf %17, %18 : vector<8x8xf32>
    %20 = vector.extract_strided_slice %10 {offsets = [0, 0], sizes = [8, 4], strides = [1, 1]} : vector<8x8xf32> to vector<8x4xf32>
    %21 = vector.extract_strided_slice %10 {offsets = [0, 4], sizes = [8, 4], strides = [1, 1]} : vector<8x8xf32> to vector<8x4xf32>
    %cst_9 = arith.constant 0.000000e+00 : f32
    %22 = vector.broadcast %cst_9 : f32 to vector<8x4xf32>
    %23 = arith.subf %22, %21 : vector<8x4xf32>
    %24 = tpu.concatenate %23, %20 in 1 : vector<8x4xf32>, vector<8x4xf32> -> vector<8x8xf32>
    %25 = arith.mulf %10, %0 : vector<8x8xf32>
    %26 = arith.mulf %24, %1 : vector<8x8xf32>
    %27 = arith.addf %25, %26 : vector<8x8xf32>
    %cst_10 = arith.constant 0.353553385 : f32
    %28 = vector.broadcast %cst_10 : f32 to vector<8x8xf32>
    %29 = arith.mulf %19, %28 : vector<8x8xf32>
    %30 = arith.truncf %29 : vector<8x8xf32> to vector<8x8xbf16>
    %31 = arith.truncf %27 : vector<8x8xf32> to vector<8x8xbf16>
    %cst_11 = arith.constant dense<0.000000e+00> : vector<8x8xf32>
    %32 = tpu.matmul %30, %31, %cst_11 {dimension_numbers = #tpu.dot_dimension_numbers<[1], [1], [0], [0], [0, 0, 1, 0], [], []>} : vector<8x8xbf16>, vector<8x8xbf16>, vector<8x8xf32> -> vector<8x8xf32>
    %cst_12 = arith.constant 0.000000e+00 : f32
    %33 = vector.broadcast %cst_12 : f32 to vector<8x8xf32>
    %34 = arith.cmpf oeq, %5, %33 : vector<8x8xf32>
    %cst_13 = arith.constant -1.000000e+09 : f32
    %35 = vector.broadcast %cst_13 : f32 to vector<8x8xf32>
    %36 = arith.select %34, %35, %32 : vector<8x8xi1>, vector<8x8xf32>
    %cst_14 = arith.constant dense<0xFF800000> : vector<8xf32>
    %37 = vector.multi_reduction <maximumf>, %36, %cst_14 [1] : vector<8x8xf32> to vector<8xf32>
    %38 = vector.shape_cast %37 : vector<8xf32> to vector<8x1xf32>
    %39 = vector.broadcast %38 : vector<8x1xf32> to vector<8x8xf32>
    %40 = arith.subf %36, %39 : vector<8x8xf32>
    %41 = math.exp %40 : vector<8x8xf32>
    %cst_15 = arith.constant dense<0.000000e+00> : vector<8xf32>
    %42 = vector.multi_reduction <add>, %41, %cst_15 [1] : vector<8x8xf32> to vector<8xf32>
    %43 = vector.shape_cast %42 : vector<8xf32> to vector<8x1xf32>
    %44 = tpu.reciprocal %43 {approx = true} : vector<8x1xf32> -> vector<8x1xf32>
    %45 = vector.broadcast %44 : vector<8x1xf32> to vector<8x8xf32>
    %46 = arith.mulf %41, %45 : vector<8x8xf32>
    %47 = arith.truncf %46 : vector<8x8xf32> to vector<8x8xbf16>
    %48 = arith.truncf %11 : vector<8x8xf32> to vector<8x8xbf16>
    %cst_16 = arith.constant dense<0.000000e+00> : vector<8x8xf32>
    %49 = tpu.matmul %47, %48, %cst_16 {dimension_numbers = #tpu.dot_dimension_numbers<[1], [0], [0], [1], [0, 0, 1, 1], [], []>} : vector<8x8xbf16>, vector<8x8xbf16>, vector<8x8xf32> -> vector<8x8xf32>
    %50 = vector.extract_strided_slice %6 {offsets = [0, 8], sizes = [8, 8], strides = [1, 1]} : vector<8x32xf32> to vector<8x8xf32>
    %51 = vector.extract_strided_slice %7 {offsets = [0, 8], sizes = [8, 8], strides = [1, 1]} : vector<8x32xf32> to vector<8x8xf32>
    %52 = vector.extract_strided_slice %8 {offsets = [0, 8], sizes = [8, 8], strides = [1, 1]} : vector<8x32xf32> to vector<8x8xf32>
    %53 = vector.extract_strided_slice %50 {offsets = [0, 0], sizes = [8, 4], strides = [1, 1]} : vector<8x8xf32> to vector<8x4xf32>
    %54 = vector.extract_strided_slice %50 {offsets = [0, 4], sizes = [8, 4], strides = [1, 1]} : vector<8x8xf32> to vector<8x4xf32>
    %cst_17 = arith.constant 0.000000e+00 : f32
    %55 = vector.broadcast %cst_17 : f32 to vector<8x4xf32>
    %56 = arith.subf %55, %54 : vector<8x4xf32>
    %57 = tpu.concatenate %56, %53 in 1 : vector<8x4xf32>, vector<8x4xf32> -> vector<8x8xf32>
    %58 = arith.mulf %50, %0 : vector<8x8xf32>
    %59 = arith.mulf %57, %1 : vector<8x8xf32>
    %60 = arith.addf %58, %59 : vector<8x8xf32>
    %61 = vector.extract_strided_slice %51 {offsets = [0, 0], sizes = [8, 4], strides = [1, 1]} : vector<8x8xf32> to vector<8x4xf32>
    %62 = vector.extract_strided_slice %51 {offsets = [0, 4], sizes = [8, 4], strides = [1, 1]} : vector<8x8xf32> to vector<8x4xf32>
    %cst_18 = arith.constant 0.000000e+00 : f32
    %63 = vector.broadcast %cst_18 : f32 to vector<8x4xf32>
    %64 = arith.subf %63, %62 : vector<8x4xf32>
    %65 = tpu.concatenate %64, %61 in 1 : vector<8x4xf32>, vector<8x4xf32> -> vector<8x8xf32>
    %66 = arith.mulf %51, %0 : vector<8x8xf32>
    %67 = arith.mulf %65, %1 : vector<8x8xf32>
    %68 = arith.addf %66, %67 : vector<8x8xf32>
    %cst_19 = arith.constant 0.353553385 : f32
    %69 = vector.broadcast %cst_19 : f32 to vector<8x8xf32>
    %70 = arith.mulf %60, %69 : vector<8x8xf32>
    %71 = arith.truncf %70 : vector<8x8xf32> to vector<8x8xbf16>
    %72 = arith.truncf %68 : vector<8x8xf32> to vector<8x8xbf16>
    %cst_20 = arith.constant dense<0.000000e+00> : vector<8x8xf32>
    %73 = tpu.matmul %71, %72, %cst_20 {dimension_numbers = #tpu.dot_dimension_numbers<[1], [1], [0], [0], [0, 0, 1, 0], [], []>} : vector<8x8xbf16>, vector<8x8xbf16>, vector<8x8xf32> -> vector<8x8xf32>
    %cst_21 = arith.constant 0.000000e+00 : f32
    %74 = vector.broadcast %cst_21 : f32 to vector<8x8xf32>
    %75 = arith.cmpf oeq, %5, %74 : vector<8x8xf32>
    %cst_22 = arith.constant -1.000000e+09 : f32
    %76 = vector.broadcast %cst_22 : f32 to vector<8x8xf32>
    %77 = arith.select %75, %76, %73 : vector<8x8xi1>, vector<8x8xf32>
    %cst_23 = arith.constant dense<0xFF800000> : vector<8xf32>
    %78 = vector.multi_reduction <maximumf>, %77, %cst_23 [1] : vector<8x8xf32> to vector<8xf32>
    %79 = vector.shape_cast %78 : vector<8xf32> to vector<8x1xf32>
    %80 = vector.broadcast %79 : vector<8x1xf32> to vector<8x8xf32>
    %81 = arith.subf %77, %80 : vector<8x8xf32>
    %82 = math.exp %81 : vector<8x8xf32>
    %cst_24 = arith.constant dense<0.000000e+00> : vector<8xf32>
    %83 = vector.multi_reduction <add>, %82, %cst_24 [1] : vector<8x8xf32> to vector<8xf32>
    %84 = vector.shape_cast %83 : vector<8xf32> to vector<8x1xf32>
    %85 = tpu.reciprocal %84 {approx = true} : vector<8x1xf32> -> vector<8x1xf32>
    %86 = vector.broadcast %85 : vector<8x1xf32> to vector<8x8xf32>
    %87 = arith.mulf %82, %86 : vector<8x8xf32>
    %88 = arith.truncf %87 : vector<8x8xf32> to vector<8x8xbf16>
    %89 = arith.truncf %52 : vector<8x8xf32> to vector<8x8xbf16>
    %cst_25 = arith.constant dense<0.000000e+00> : vector<8x8xf32>
    %90 = tpu.matmul %88, %89, %cst_25 {dimension_numbers = #tpu.dot_dimension_numbers<[1], [0], [0], [1], [0, 0, 1, 1], [], []>} : vector<8x8xbf16>, vector<8x8xbf16>, vector<8x8xf32> -> vector<8x8xf32>
    %91 = vector.extract_strided_slice %6 {offsets = [0, 16], sizes = [8, 8], strides = [1, 1]} : vector<8x32xf32> to vector<8x8xf32>
    %92 = vector.extract_strided_slice %7 {offsets = [0, 16], sizes = [8, 8], strides = [1, 1]} : vector<8x32xf32> to vector<8x8xf32>
    %93 = vector.extract_strided_slice %8 {offsets = [0, 16], sizes = [8, 8], strides = [1, 1]} : vector<8x32xf32> to vector<8x8xf32>
    %94 = vector.extract_strided_slice %91 {offsets = [0, 0], sizes = [8, 4], strides = [1, 1]} : vector<8x8xf32> to vector<8x4xf32>
    %95 = vector.extract_strided_slice %91 {offsets = [0, 4], sizes = [8, 4], strides = [1, 1]} : vector<8x8xf32> to vector<8x4xf32>
    %cst_26 = arith.constant 0.000000e+00 : f32
    %96 = vector.broadcast %cst_26 : f32 to vector<8x4xf32>
    %97 = arith.subf %96, %95 : vector<8x4xf32>
    %98 = tpu.concatenate %97, %94 in 1 : vector<8x4xf32>, vector<8x4xf32> -> vector<8x8xf32>
    %99 = arith.mulf %91, %0 : vector<8x8xf32>
    %100 = arith.mulf %98, %1 : vector<8x8xf32>
    %101 = arith.addf %99, %100 : vector<8x8xf32>
    %102 = vector.extract_strided_slice %92 {offsets = [0, 0], sizes = [8, 4], strides = [1, 1]} : vector<8x8xf32> to vector<8x4xf32>
    %103 = vector.extract_strided_slice %92 {offsets = [0, 4], sizes = [8, 4], strides = [1, 1]} : vector<8x8xf32> to vector<8x4xf32>
    %cst_27 = arith.constant 0.000000e+00 : f32
    %104 = vector.broadcast %cst_27 : f32 to vector<8x4xf32>
    %105 = arith.subf %104, %103 : vector<8x4xf32>
    %106 = tpu.concatenate %105, %102 in 1 : vector<8x4xf32>, vector<8x4xf32> -> vector<8x8xf32>
    %107 = arith.mulf %92, %0 : vector<8x8xf32>
    %108 = arith.mulf %106, %1 : vector<8x8xf32>
    %109 = arith.addf %107, %108 : vector<8x8xf32>
    %cst_28 = arith.constant 0.353553385 : f32
    %110 = vector.broadcast %cst_28 : f32 to vector<8x8xf32>
    %111 = arith.mulf %101, %110 : vector<8x8xf32>
    %112 = arith.truncf %111 : vector<8x8xf32> to vector<8x8xbf16>
    %113 = arith.truncf %109 : vector<8x8xf32> to vector<8x8xbf16>
    %cst_29 = arith.constant dense<0.000000e+00> : vector<8x8xf32>
    %114 = tpu.matmul %112, %113, %cst_29 {dimension_numbers = #tpu.dot_dimension_numbers<[1], [1], [0], [0], [0, 0, 1, 0], [], []>} : vector<8x8xbf16>, vector<8x8xbf16>, vector<8x8xf32> -> vector<8x8xf32>
    %cst_30 = arith.constant 0.000000e+00 : f32
    %115 = vector.broadcast %cst_30 : f32 to vector<8x8xf32>
    %116 = arith.cmpf oeq, %5, %115 : vector<8x8xf32>
    %cst_31 = arith.constant -1.000000e+09 : f32
    %117 = vector.broadcast %cst_31 : f32 to vector<8x8xf32>
    %118 = arith.select %116, %117, %114 : vector<8x8xi1>, vector<8x8xf32>
    %cst_32 = arith.constant dense<0xFF800000> : vector<8xf32>
    %119 = vector.multi_reduction <maximumf>, %118, %cst_32 [1] : vector<8x8xf32> to vector<8xf32>
    %120 = vector.shape_cast %119 : vector<8xf32> to vector<8x1xf32>
    %121 = vector.broadcast %120 : vector<8x1xf32> to vector<8x8xf32>
    %122 = arith.subf %118, %121 : vector<8x8xf32>
    %123 = math.exp %122 : vector<8x8xf32>
    %cst_33 = arith.constant dense<0.000000e+00> : vector<8xf32>
    %124 = vector.multi_reduction <add>, %123, %cst_33 [1] : vector<8x8xf32> to vector<8xf32>
    %125 = vector.shape_cast %124 : vector<8xf32> to vector<8x1xf32>
    %126 = tpu.reciprocal %125 {approx = true} : vector<8x1xf32> -> vector<8x1xf32>
    %127 = vector.broadcast %126 : vector<8x1xf32> to vector<8x8xf32>
    %128 = arith.mulf %123, %127 : vector<8x8xf32>
    %129 = arith.truncf %128 : vector<8x8xf32> to vector<8x8xbf16>
    %130 = arith.truncf %93 : vector<8x8xf32> to vector<8x8xbf16>
    %cst_34 = arith.constant dense<0.000000e+00> : vector<8x8xf32>
    %131 = tpu.matmul %129, %130, %cst_34 {dimension_numbers = #tpu.dot_dimension_numbers<[1], [0], [0], [1], [0, 0, 1, 1], [], []>} : vector<8x8xbf16>, vector<8x8xbf16>, vector<8x8xf32> -> vector<8x8xf32>
    %132 = vector.extract_strided_slice %6 {offsets = [0, 24], sizes = [8, 8], strides = [1, 1]} : vector<8x32xf32> to vector<8x8xf32>
    %133 = vector.extract_strided_slice %7 {offsets = [0, 24], sizes = [8, 8], strides = [1, 1]} : vector<8x32xf32> to vector<8x8xf32>
    %134 = vector.extract_strided_slice %8 {offsets = [0, 24], sizes = [8, 8], strides = [1, 1]} : vector<8x32xf32> to vector<8x8xf32>
    %135 = vector.extract_strided_slice %132 {offsets = [0, 0], sizes = [8, 4], strides = [1, 1]} : vector<8x8xf32> to vector<8x4xf32>
    %136 = vector.extract_strided_slice %132 {offsets = [0, 4], sizes = [8, 4], strides = [1, 1]} : vector<8x8xf32> to vector<8x4xf32>
    %cst_35 = arith.constant 0.000000e+00 : f32
    %137 = vector.broadcast %cst_35 : f32 to vector<8x4xf32>
    %138 = arith.subf %137, %136 : vector<8x4xf32>
    %139 = tpu.concatenate %138, %135 in 1 : vector<8x4xf32>, vector<8x4xf32> -> vector<8x8xf32>
    %140 = arith.mulf %132, %0 : vector<8x8xf32>
    %141 = arith.mulf %139, %1 : vector<8x8xf32>
    %142 = arith.addf %140, %141 : vector<8x8xf32>
    %143 = vector.extract_strided_slice %133 {offsets = [0, 0], sizes = [8, 4], strides = [1, 1]} : vector<8x8xf32> to vector<8x4xf32>
    %144 = vector.extract_strided_slice %133 {offsets = [0, 4], sizes = [8, 4], strides = [1, 1]} : vector<8x8xf32> to vector<8x4xf32>
    %cst_36 = arith.constant 0.000000e+00 : f32
    %145 = vector.broadcast %cst_36 : f32 to vector<8x4xf32>
    %146 = arith.subf %145, %144 : vector<8x4xf32>
    %147 = tpu.concatenate %146, %143 in 1 : vector<8x4xf32>, vector<8x4xf32> -> vector<8x8xf32>
    %148 = arith.mulf %133, %0 : vector<8x8xf32>
    %149 = arith.mulf %147, %1 : vector<8x8xf32>
    %150 = arith.addf %148, %149 : vector<8x8xf32>
    %cst_37 = arith.constant 0.353553385 : f32
    %151 = vector.broadcast %cst_37 : f32 to vector<8x8xf32>
    %152 = arith.mulf %142, %151 : vector<8x8xf32>
    %153 = arith.truncf %152 : vector<8x8xf32> to vector<8x8xbf16>
    %154 = arith.truncf %150 : vector<8x8xf32> to vector<8x8xbf16>
    %cst_38 = arith.constant dense<0.000000e+00> : vector<8x8xf32>
    %155 = tpu.matmul %153, %154, %cst_38 {dimension_numbers = #tpu.dot_dimension_numbers<[1], [1], [0], [0], [0, 0, 1, 0], [], []>} : vector<8x8xbf16>, vector<8x8xbf16>, vector<8x8xf32> -> vector<8x8xf32>
    %cst_39 = arith.constant 0.000000e+00 : f32
    %156 = vector.broadcast %cst_39 : f32 to vector<8x8xf32>
    %157 = arith.cmpf oeq, %5, %156 : vector<8x8xf32>
    %cst_40 = arith.constant -1.000000e+09 : f32
    %158 = vector.broadcast %cst_40 : f32 to vector<8x8xf32>
    %159 = arith.select %157, %158, %155 : vector<8x8xi1>, vector<8x8xf32>
    %cst_41 = arith.constant dense<0xFF800000> : vector<8xf32>
    %160 = vector.multi_reduction <maximumf>, %159, %cst_41 [1] : vector<8x8xf32> to vector<8xf32>
    %161 = vector.shape_cast %160 : vector<8xf32> to vector<8x1xf32>
    %162 = vector.broadcast %161 : vector<8x1xf32> to vector<8x8xf32>
    %163 = arith.subf %159, %162 : vector<8x8xf32>
    %164 = math.exp %163 : vector<8x8xf32>
    %cst_42 = arith.constant dense<0.000000e+00> : vector<8xf32>
    %165 = vector.multi_reduction <add>, %164, %cst_42 [1] : vector<8x8xf32> to vector<8xf32>
    %166 = vector.shape_cast %165 : vector<8xf32> to vector<8x1xf32>
    %167 = tpu.reciprocal %166 {approx = true} : vector<8x1xf32> -> vector<8x1xf32>
    %168 = vector.broadcast %167 : vector<8x1xf32> to vector<8x8xf32>
    %169 = arith.mulf %164, %168 : vector<8x8xf32>
    %170 = arith.truncf %169 : vector<8x8xf32> to vector<8x8xbf16>
    %171 = arith.truncf %134 : vector<8x8xf32> to vector<8x8xbf16>
    %cst_43 = arith.constant dense<0.000000e+00> : vector<8x8xf32>
    %172 = tpu.matmul %170, %171, %cst_43 {dimension_numbers = #tpu.dot_dimension_numbers<[1], [0], [0], [1], [0, 0, 1, 1], [], []>} : vector<8x8xbf16>, vector<8x8xbf16>, vector<8x8xf32> -> vector<8x8xf32>
    %173 = tpu.concatenate %49, %90, %131, %172 in 1 : vector<8x8xf32>, vector<8x8xf32>, vector<8x8xf32>, vector<8x8xf32> -> vector<8x32xf32>
    %c0_44 = arith.constant 0 : index
    %c0_45 = arith.constant 0 : index
    %c0_46 = arith.constant 0 : index
    %174 = vector.load %arg5[%c0_44, %c0_45, %c0_46] : memref<1x8x32xf32, #tpu.memory_space<vmem>>, vector<1x8x32xf32>
    %175 = vector.shape_cast %174 : vector<1x8x32xf32> to vector<8x32xf32>
    %176 = vector.shape_cast %173 : vector<8x32xf32> to vector<1x8x32xf32>
    tpu.vector_store %arg5[%c0_44, %c0_45, %c0_46], %176 {strides = array<i32>} : memref<1x8x32xf32, #tpu.memory_space<vmem>>, vector<1x8x32xf32>,
    return
  }
  func.func @transform_0(%arg0: i32) -> (i32, i32, i32) {
    %c0_i32 = arith.constant 0 : i32
    %c0_i32_0 = arith.constant 0 : i32
    %c0_i32_1 = arith.constant 0 : i32
    return %arg0, %c0_i32, %c0_i32_0 : i32, i32, i32
  }
  func.func @transform_1(%arg0: i32) -> (i32, i32, i32) {
    %c0_i32 = arith.constant 0 : i32
    %c0_i32_0 = arith.constant 0 : i32
    %c0_i32_1 = arith.constant 0 : i32
    return %arg0, %c0_i32, %c0_i32_0 : i32, i32, i32
  }
  func.func @transform_2(%arg0: i32) -> (i32, i32) {
    %c0_i32 = arith.constant 0 : i32
    %c0_i32_0 = arith.constant 0 : i32
    %c0_i32_1 = arith.constant 0 : i32
    return %c0_i32, %c0_i32_0 : i32, i32
  }
  func.func @transform_3(%arg0: i32) -> (i32, i32) {
    %c0_i32 = arith.constant 0 : i32
    %c0_i32_0 = arith.constant 0 : i32
    %c0_i32_1 = arith.constant 0 : i32
    return %c0_i32, %c0_i32_0 : i32, i32
  }
  func.func @transform_4(%arg0: i32) -> (i32, i32, i32) {
    %c0_i32 = arith.constant 0 : i32
    %c0_i32_0 = arith.constant 0 : i32
    %c0_i32_1 = arith.constant 0 : i32
    return %arg0, %c0_i32, %c0_i32_0 : i32, i32, i32
  }
}

module attributes {stable_mosaic.version = 11 : i64} {
  func.func @_fused_linear_kernel(%arg0: i32, %arg1: i32, %arg2: memref<16x32xf32, #tpu.memory_space<vmem>>, %arg3: memref<32x64xbf16, #tpu.memory_space<vmem>>, %arg4: memref<1x64xf32, #tpu.memory_space<vmem>>, %arg5: memref<16x64xf32, #tpu.memory_space<vmem>>) attributes {dimension_semantics = [#tpu.dimension_semantics<parallel>, #tpu.dimension_semantics<parallel>], iteration_bounds = array<i64: 1, 1>, scalar_prefetch = 0 : i64, scratch_operands = 0 : i64, tpu.core_type = #tpu.core_type<tc>, window_params = [{transform_indices = @transform_0, window_bounds = array<i64: 16, 32>}, {transform_indices = @transform_1, window_bounds = array<i64: 32, 64>}, {transform_indices = @transform_2, window_bounds = array<i64: 1, 64>}, {transform_indices = @transform_3, window_bounds = array<i64: 16, 64>}]} {
    %c0 = arith.constant 0 : index
    %c0_0 = arith.constant 0 : index
    %0 = vector.load %arg2[%c0, %c0_0] : memref<16x32xf32, #tpu.memory_space<vmem>>, vector<16x32xf32>
    %1 = arith.truncf %0 : vector<16x32xf32> to vector<16x32xbf16>
    %c0_1 = arith.constant 0 : index
    %c0_2 = arith.constant 0 : index
    %2 = vector.load %arg3[%c0_1, %c0_2] : memref<32x64xbf16, #tpu.memory_space<vmem>>, vector<32x64xbf16>
    %cst = arith.constant dense<0.000000e+00> : vector<16x64xf32>
    %3 = tpu.matmul %1, %2, %cst {dimension_numbers = #tpu.dot_dimension_numbers<[1], [0], [0], [1], [0, 0, 1, 1], [], []>} : vector<16x32xbf16>, vector<32x64xbf16>, vector<16x64xf32> -> vector<16x64xf32>
    %c0_3 = arith.constant 0 : index
    %c0_4 = arith.constant 0 : index
    %4 = vector.load %arg4[%c0_3, %c0_4] : memref<1x64xf32, #tpu.memory_space<vmem>>, vector<1x64xf32>
    %5 = vector.broadcast %4 : vector<1x64xf32> to vector<16x64xf32>
    %6 = arith.addf %3, %5 : vector<16x64xf32>
    %c0_5 = arith.constant 0 : index
    %c0_6 = arith.constant 0 : index
    %7 = vector.load %arg5[%c0_5, %c0_6] : memref<16x64xf32, #tpu.memory_space<vmem>>, vector<16x64xf32>
    tpu.vector_store %arg5[%c0_5, %c0_6], %6 {strides = array<i32>} : memref<16x64xf32, #tpu.memory_space<vmem>>, vector<16x64xf32>,
    return
  }
  func.func @transform_0(%arg0: i32, %arg1: i32) -> (i32, i32) {
    %c0_i32 = arith.constant 0 : i32
    %c0_i32_0 = arith.constant 0 : i32
    return %arg0, %c0_i32 : i32, i32
  }
  func.func @transform_1(%arg0: i32, %arg1: i32) -> (i32, i32) {
    %c0_i32 = arith.constant 0 : i32
    %c0_i32_0 = arith.constant 0 : i32
    return %c0_i32, %arg1 : i32, i32
  }
  func.func @transform_2(%arg0: i32, %arg1: i32) -> (i32, i32) {
    %c0_i32 = arith.constant 0 : i32
    %c0_i32_0 = arith.constant 0 : i32
    return %c0_i32, %arg1 : i32, i32
  }
  func.func @transform_3(%arg0: i32, %arg1: i32) -> (i32, i32) {
    %c0_i32 = arith.constant 0 : i32
    return %arg0, %arg1 : i32, i32
  }
}

module attributes {stable_mosaic.version = 11 : i64} {
  func.func @_fused_linear_kernel(%arg0: i32, %arg1: i32, %arg2: memref<16x32xf32, #tpu.memory_space<vmem>>, %arg3: memref<1x32xf32, #tpu.memory_space<vmem>>, %arg4: memref<1x32xf32, #tpu.memory_space<vmem>>, %arg5: memref<32x64xbf16, #tpu.memory_space<vmem>>, %arg6: memref<1x64xf32, #tpu.memory_space<vmem>>, %arg7: memref<16x64xf32, #tpu.memory_space<vmem>>) attributes {dimension_semantics = [#tpu.dimension_semantics<parallel>, #tpu.dimension_semantics<parallel>], iteration_bounds = array<i64: 1, 1>, scalar_prefetch = 0 : i64, scratch_operands = 0 : i64, tpu.core_type = #tpu.core_type<tc>, window_params = [{transform_indices = @transform_0, window_bounds = array<i64: 16, 32>}, {pipeline_mode = #tpu.pipeline_mode<synchronous>, transform_indices = @transform_1, window_bounds = array<i64: 1, 32>}, {pipeline_mode = #tpu.pipeline_mode<synchronous>, transform_indices = @transform_2, window_bounds = array<i64: 1, 32>}, {transform_indices = @transform_3, window_bounds = array<i64: 32, 64>}, {transform_indices = @transform_4, window_bounds = array<i64: 1, 64>}, {transform_indices = @transform_5, window_bounds = array<i64: 16, 64>}]} {
    %c0 = arith.constant 0 : index
    %c0_0 = arith.constant 0 : index
    %0 = vector.load %arg2[%c0, %c0_0] : memref<16x32xf32, #tpu.memory_space<vmem>>, vector<16x32xf32>
    %cst = arith.constant dense<0.000000e+00> : vector<16xf32>
    %1 = vector.multi_reduction <add>, %0, %cst [1] : vector<16x32xf32> to vector<16xf32>
    %2 = vector.shape_cast %1 : vector<16xf32> to vector<16x1xf32>
    %cst_1 = arith.constant 3.200000e+01 : f32
    %3 = vector.broadcast %cst_1 : f32 to vector<16x1xf32>
    %4 = arith.divf %2, %3 : vector<16x1xf32>
    %5 = vector.broadcast %4 : vector<16x1xf32> to vector<16x32xf32>
    %6 = arith.subf %0, %5 : vector<16x32xf32>
    %7 = arith.mulf %6, %6 : vector<16x32xf32>
    %cst_2 = arith.constant dense<0.000000e+00> : vector<16xf32>
    %8 = vector.multi_reduction <add>, %7, %cst_2 [1] : vector<16x32xf32> to vector<16xf32>
    %9 = vector.shape_cast %8 : vector<16xf32> to vector<16x1xf32>
    %cst_3 = arith.constant 3.100000e+01 : f32
    %10 = vector.broadcast %cst_3 : f32 to vector<16x1xf32>
    %11 = arith.divf %9, %10 : vector<16x1xf32>
    %12 = math.sqrt %11 : vector<16x1xf32>
    %c0_4 = arith.constant 0 : index
    %c0_5 = arith.constant 0 : index
    %13 = vector.load %arg3[%c0_4, %c0_5] : memref<1x32xf32, #tpu.memory_space<vmem>>, vector<1x32xf32>
    %14 = vector.broadcast %13 : vector<1x32xf32> to vector<16x32xf32>
    %15 = arith.mulf %14, %6 : vector<16x32xf32>
    %cst_6 = arith.constant 9.99999997E-7 : f32
    %16 = vector.broadcast %cst_6 : f32 to vector<16x1xf32>
    %17 = arith.addf %12, %16 : vector<16x1xf32>
    %18 = tpu.reciprocal %17 {approx = true} : vector<16x1xf32> -> vector<16x1xf32>
    %19 = vector.broadcast %18 : vector<16x1xf32> to vector<16x32xf32>
    %20 = arith.mulf %15, %19 : vector<16x32xf32>
    %c0_7 = arith.constant 0 : index
    %c0_8 = arith.constant 0 : index
    %21 = vector.load %arg4[%c0_7, %c0_8] : memref<1x32xf32, #tpu.memory_space<vmem>>, vector<1x32xf32>
    %22 = vector.broadcast %21 : vector<1x32xf32> to vector<16x32xf32>
    %23 = arith.addf %20, %22 : vector<16x32xf32>
    %24 = arith.truncf %23 : vector<16x32xf32> to vector<16x32xbf16>
    %c0_9 = arith.constant 0 : index
    %c0_10 = arith.constant 0 : index
    %25 = vector.load %arg5[%c0_9, %c0_10] : memref<32x64xbf16, #tpu.memory_space<vmem>>, vector<32x64xbf16>
    %cst_11 = arith.constant dense<0.000000e+00> : vector<16x64xf32>
    %26 = tpu.matmul %24, %25, %cst_11 {dimension_numbers = #tpu.dot_dimension_numbers<[1], [0], [0], [1], [0, 0, 1, 1], [], []>} : vector<16x32xbf16>, vector<32x64xbf16>, vector<16x64xf32> -> vector<16x64xf32>
    %c0_12 = arith.constant 0 : index
    %c0_13 = arith.constant 0 : index
    %27 = vector.load %arg6[%c0_12, %c0_13] : memref<1x64xf32, #tpu.memory_space<vmem>>, vector<1x64xf32>
    %28 = vector.broadcast %27 : vector<1x64xf32> to vector<16x64xf32>
    %29 = arith.addf %26, %28 : vector<16x64xf32>
    %cst_14 = arith.constant 0.000000e+00 : f32
    %30 = vector.broadcast %cst_14 : f32 to vector<16x64xf32>
    %31 = arith.maximumf %29, %30 : vector<16x64xf32>
    %c0_15 = arith.constant 0 : index
    %c0_16 = arith.constant 0 : index
    %32 = vector.load %arg7[%c0_15, %c0_16] : memref<16x64xf32, #tpu.memory_space<vmem>>, vector<16x64xf32>
    tpu.vector_store %arg7[%c0_15, %c0_16], %31 {strides = array<i32>} : memref<16x64xf32, #tpu.memory_space<vmem>>, vector<16x64xf32>,
    return
  }
  func.func @transform_0(%arg0: i32, %arg1: i32) -> (i32, i32) {
    %c0_i32 = arith.constant 0 : i32
    %c0_i32_0 = arith.constant 0 : i32
    return %arg0, %c0_i32 : i32, i32
  }
  func.func @transform_1(%arg0: i32, %arg1: i32) -> (i32, i32) {
    %c0_i32 = arith.constant 0 : i32
    %c0_i32_0 = arith.constant 0 : i32
    %c0_i32_1 = arith.constant 0 : i32
    return %c0_i32, %c0_i32_0 : i32, i32
  }
  func.func @transform_2(%arg0: i32, %arg1: i32) -> (i32, i32) {
    %c0_i32 = arith.constant 0 : i32
    %c0_i32_0 = arith.constant 0 : i32
    %c0_i32_1 = arith.constant 0 : i32
    return %c0_i32, %c0_i32_0 : i32, i32
  }
  func.func @transform_3(%arg0: i32, %arg1: i32) -> (i32, i32) {
    %c0_i32 = arith.constant 0 : i32
    %c0_i32_0 = arith.constant 0 : i32
    return %c0_i32, %arg1 : i32, i32
  }
  func.func @transform_4(%arg0: i32, %arg1: i32) -> (i32, i32) {
    %c0_i32 = arith.constant 0 : i32
    %c0_i32_0 = arith.constant 0 : i32
    return %c0_i32, %arg1 : i32, i32
  }
  func.func @transform_5(%arg0: i32, %arg1: i32) -> (i32, i32) {
    %c0_i32 = arith.constant 0 : i32
    return %arg0, %arg1 : i32, i32
  }
}

module attributes {stable_mosaic.version = 11 : i64} {
  func.func @_cross_attn_kernel(%arg0: i32, %arg1: memref<1x8x32xf32, #tpu.memory_space<vmem>>, %arg2: memref<1x8x64xf32, #tpu.memory_space<vmem>>, %arg3: memref<1x8x8xf32, #tpu.memory_space<vmem>>, %arg4: memref<1x8x32xf32, #tpu.memory_space<vmem>>) attributes {dimension_semantics = [#tpu.dimension_semantics<parallel>], iteration_bounds = array<i64: 2>, scalar_prefetch = 0 : i64, scratch_operands = 0 : i64, tpu.core_type = #tpu.core_type<tc>, window_params = [{transform_indices = @transform_0, window_bounds = array<i64: 1, 8, 32>}, {transform_indices = @transform_1, window_bounds = array<i64: 1, 8, 64>}, {transform_indices = @transform_2, window_bounds = array<i64: 1, 8, 8>}, {transform_indices = @transform_3, window_bounds = array<i64: 1, 8, 32>}]} {
    %c0 = arith.constant 0 : index
    %c0_0 = arith.constant 0 : index
    %c0_1 = arith.constant 0 : index
    %0 = vector.load %arg1[%c0, %c0_0, %c0_1] : memref<1x8x32xf32, #tpu.memory_space<vmem>>, vector<1x8x32xf32>
    %1 = vector.shape_cast %0 : vector<1x8x32xf32> to vector<8x32xf32>
    %c0_2 = arith.constant 0 : index
    %c0_3 = arith.constant 0 : index
    %c0_4 = arith.constant 0 : index
    %2 = vector.load %arg2[%c0_2, %c0_3, %c0_4] : memref<1x8x64xf32, #tpu.memory_space<vmem>>, vector<1x8x64xf32>
    %3 = vector.shape_cast %2 : vector<1x8x64xf32> to vector<8x64xf32>
    %c0_5 = arith.constant 0 : index
    %c0_6 = arith.constant 0 : index
    %c0_7 = arith.constant 0 : index
    %4 = vector.load %arg3[%c0_5, %c0_6, %c0_7] : memref<1x8x8xf32, #tpu.memory_space<vmem>>, vector<1x8x8xf32>
    %5 = vector.shape_cast %4 : vector<1x8x8xf32> to vector<8x8xf32>
    %6 = vector.extract_strided_slice %3 {offsets = [0, 0], sizes = [8, 32], strides = [1, 1]} : vector<8x64xf32> to vector<8x32xf32>
    %7 = vector.extract_strided_slice %3 {offsets = [0, 32], sizes = [8, 32], strides = [1, 1]} : vector<8x64xf32> to vector<8x32xf32>
    %8 = vector.extract_strided_slice %1 {offsets = [0, 0], sizes = [8, 8], strides = [1, 1]} : vector<8x32xf32> to vector<8x8xf32>
    %9 = vector.extract_strided_slice %6 {offsets = [0, 0], sizes = [8, 8], strides = [1, 1]} : vector<8x32xf32> to vector<8x8xf32>
    %10 = vector.extract_strided_slice %7 {offsets = [0, 0], sizes = [8, 8], strides = [1, 1]} : vector<8x32xf32> to vector<8x8xf32>
    %cst = arith.constant 0.353553385 : f32
    %11 = vector.broadcast %cst : f32 to vector<8x8xf32>
    %12 = arith.mulf %8, %11 : vector<8x8xf32>
    %13 = arith.truncf %12 : vector<8x8xf32> to vector<8x8xbf16>
    %14 = arith.truncf %9 : vector<8x8xf32> to vector<8x8xbf16>
    %cst_8 = arith.constant dense<0.000000e+00> : vector<8x8xf32>
    %15 = tpu.matmul %13, %14, %cst_8 {dimension_numbers = #tpu.dot_dimension_numbers<[1], [1], [0], [0], [0, 0, 1, 0], [], []>} : vector<8x8xbf16>, vector<8x8xbf16>, vector<8x8xf32> -> vector<8x8xf32>
    %cst_9 = arith.constant 0.000000e+00 : f32
    %16 = vector.broadcast %cst_9 : f32 to vector<8x8xf32>
    %17 = arith.cmpf oeq, %5, %16 : vector<8x8xf32>
    %cst_10 = arith.constant -1.000000e+09 : f32
    %18 = vector.broadcast %cst_10 : f32 to vector<8x8xf32>
    %19 = arith.select %17, %18, %15 : vector<8x8xi1>, vector<8x8xf32>
    %cst_11 = arith.constant dense<0xFF800000> : vector<8xf32>
    %20 = vector.multi_reduction <maximumf>, %19, %cst_11 [1] : vector<8x8xf32> to vector<8xf32>
    %21 = vector.shape_cast %20 : vector<8xf32> to vector<8x1xf32>
    %22 = vector.broadcast %21 : vector<8x1xf32> to vector<8x8xf32>
    %23 = arith.subf %19, %22 : vector<8x8xf32>
    %24 = math.exp %23 : vector<8x8xf32>
    %cst_12 = arith.constant dense<0.000000e+00> : vector<8xf32>
    %25 = vector.multi_reduction <add>, %24, %cst_12 [1] : vector<8x8xf32> to vector<8xf32>
    %26 = vector.shape_cast %25 : vector<8xf32> to vector<8x1xf32>
    %27 = tpu.reciprocal %26 {approx = true} : vector<8x1xf32> -> vector<8x1xf32>
    %28 = vector.broadcast %27 : vector<8x1xf32> to vector<8x8xf32>
    %29 = arith.mulf %24, %28 : vector<8x8xf32>
    %30 = arith.truncf %29 : vector<8x8xf32> to vector<8x8xbf16>
    %31 = arith.truncf %10 : vector<8x8xf32> to vector<8x8xbf16>
    %cst_13 = arith.constant dense<0.000000e+00> : vector<8x8xf32>
    %32 = tpu.matmul %30, %31, %cst_13 {dimension_numbers = #tpu.dot_dimension_numbers<[1], [0], [0], [1], [0, 0, 1, 1], [], []>} : vector<8x8xbf16>, vector<8x8xbf16>, vector<8x8xf32> -> vector<8x8xf32>
    %33 = vector.extract_strided_slice %1 {offsets = [0, 8], sizes = [8, 8], strides = [1, 1]} : vector<8x32xf32> to vector<8x8xf32>
    %34 = vector.extract_strided_slice %6 {offsets = [0, 8], sizes = [8, 8], strides = [1, 1]} : vector<8x32xf32> to vector<8x8xf32>
    %35 = vector.extract_strided_slice %7 {offsets = [0, 8], sizes = [8, 8], strides = [1, 1]} : vector<8x32xf32> to vector<8x8xf32>
    %cst_14 = arith.constant 0.353553385 : f32
    %36 = vector.broadcast %cst_14 : f32 to vector<8x8xf32>
    %37 = arith.mulf %33, %36 : vector<8x8xf32>
    %38 = arith.truncf %37 : vector<8x8xf32> to vector<8x8xbf16>
    %39 = arith.truncf %34 : vector<8x8xf32> to vector<8x8xbf16>
    %cst_15 = arith.constant dense<0.000000e+00> : vector<8x8xf32>
    %40 = tpu.matmul %38, %39, %cst_15 {dimension_numbers = #tpu.dot_dimension_numbers<[1], [1], [0], [0], [0, 0, 1, 0], [], []>} : vector<8x8xbf16>, vector<8x8xbf16>, vector<8x8xf32> -> vector<8x8xf32>
    %cst_16 = arith.constant 0.000000e+00 : f32
    %41 = vector.broadcast %cst_16 : f32 to vector<8x8xf32>
    %42 = arith.cmpf oeq, %5, %41 : vector<8x8xf32>
    %cst_17 = arith.constant -1.000000e+09 : f32
    %43 = vector.broadcast %cst_17 : f32 to vector<8x8xf32>
    %44 = arith.select %42, %43, %40 : vector<8x8xi1>, vector<8x8xf32>
    %cst_18 = arith.constant dense<0xFF800000> : vector<8xf32>
    %45 = vector.multi_reduction <maximumf>, %44, %cst_18 [1] : vector<8x8xf32> to vector<8xf32>
    %46 = vector.shape_cast %45 : vector<8xf32> to vector<8x1xf32>
    %47 = vector.broadcast %46 : vector<8x1xf32> to vector<8x8xf32>
    %48 = arith.subf %44, %47 : vector<8x8xf32>
    %49 = math.exp %48 : vector<8x8xf32>
    %cst_19 = arith.constant dense<0.000000e+00> : vector<8xf32>
    %50 = vector.multi_reduction <add>, %49, %cst_19 [1] : vector<8x8xf32> to vector<8xf32>
    %51 = vector.shape_cast %50 : vector<8xf32> to vector<8x1xf32>
    %52 = tpu.reciprocal %51 {approx = true} : vector<8x1xf32> -> vector<8x1xf32>
    %53 = vector.broadcast %52 : vector<8x1xf32> to vector<8x8xf32>
    %54 = arith.mulf %49, %53 : vector<8x8xf32>
    %55 = arith.truncf %54 : vector<8x8xf32> to vector<8x8xbf16>
    %56 = arith.truncf %35 : vector<8x8xf32> to vector<8x8xbf16>
    %cst_20 = arith.constant dense<0.000000e+00> : vector<8x8xf32>
    %57 = tpu.matmul %55, %56, %cst_20 {dimension_numbers = #tpu.dot_dimension_numbers<[1], [0], [0], [1], [0, 0, 1, 1], [], []>} : vector<8x8xbf16>, vector<8x8xbf16>, vector<8x8xf32> -> vector<8x8xf32>
    %58 = vector.extract_strided_slice %1 {offsets = [0, 16], sizes = [8, 8], strides = [1, 1]} : vector<8x32xf32> to vector<8x8xf32>
    %59 = vector.extract_strided_slice %6 {offsets = [0, 16], sizes = [8, 8], strides = [1, 1]} : vector<8x32xf32> to vector<8x8xf32>
    %60 = vector.extract_strided_slice %7 {offsets = [0, 16], sizes = [8, 8], strides = [1, 1]} : vector<8x32xf32> to vector<8x8xf32>
    %cst_21 = arith.constant 0.353553385 : f32
    %61 = vector.broadcast %cst_21 : f32 to vector<8x8xf32>
    %62 = arith.mulf %58, %61 : vector<8x8xf32>
    %63 = arith.truncf %62 : vector<8x8xf32> to vector<8x8xbf16>
    %64 = arith.truncf %59 : vector<8x8xf32> to vector<8x8xbf16>
    %cst_22 = arith.constant dense<0.000000e+00> : vector<8x8xf32>
    %65 = tpu.matmul %63, %64, %cst_22 {dimension_numbers = #tpu.dot_dimension_numbers<[1], [1], [0], [0], [0, 0, 1, 0], [], []>} : vector<8x8xbf16>, vector<8x8xbf16>, vector<8x8xf32> -> vector<8x8xf32>
    %cst_23 = arith.constant 0.000000e+00 : f32
    %66 = vector.broadcast %cst_23 : f32 to vector<8x8xf32>
    %67 = arith.cmpf oeq, %5, %66 : vector<8x8xf32>
    %cst_24 = arith.constant -1.000000e+09 : f32
    %68 = vector.broadcast %cst_24 : f32 to vector<8x8xf32>
    %69 = arith.select %67, %68, %65 : vector<8x8xi1>, vector<8x8xf32>
    %cst_25 = arith.constant dense<0xFF800000> : vector<8xf32>
    %70 = vector.multi_reduction <maximumf>, %69, %cst_25 [1] : vector<8x8xf32> to vector<8xf32>
    %71 = vector.shape_cast %70 : vector<8xf32> to vector<8x1xf32>
    %72 = vector.broadcast %71 : vector<8x1xf32> to vector<8x8xf32>
    %73 = arith.subf %69, %72 : vector<8x8xf32>
    %74 = math.exp %73 : vector<8x8xf32>
    %cst_26 = arith.constant dense<0.000000e+00> : vector<8xf32>
    %75 = vector.multi_reduction <add>, %74, %cst_26 [1] : vector<8x8xf32> to vector<8xf32>
    %76 = vector.shape_cast %75 : vector<8xf32> to vector<8x1xf32>
    %77 = tpu.reciprocal %76 {approx = true} : vector<8x1xf32> -> vector<8x1xf32>
    %78 = vector.broadcast %77 : vector<8x1xf32> to vector<8x8xf32>
    %79 = arith.mulf %74, %78 : vector<8x8xf32>
    %80 = arith.truncf %79 : vector<8x8xf32> to vector<8x8xbf16>
    %81 = arith.truncf %60 : vector<8x8xf32> to vector<8x8xbf16>
    %cst_27 = arith.constant dense<0.000000e+00> : vector<8x8xf32>
    %82 = tpu.matmul %80, %81, %cst_27 {dimension_numbers = #tpu.dot_dimension_numbers<[1], [0], [0], [1], [0, 0, 1, 1], [], []>} : vector<8x8xbf16>, vector<8x8xbf16>, vector<8x8xf32> -> vector<8x8xf32>
    %83 = vector.extract_strided_slice %1 {offsets = [0, 24], sizes = [8, 8], strides = [1, 1]} : vector<8x32xf32> to vector<8x8xf32>
    %84 = vector.extract_strided_slice %6 {offsets = [0, 24], sizes = [8, 8], strides = [1, 1]} : vector<8x32xf32> to vector<8x8xf32>
    %85 = vector.extract_strided_slice %7 {offsets = [0, 24], sizes = [8, 8], strides = [1, 1]} : vector<8x32xf32> to vector<8x8xf32>
    %cst_28 = arith.constant 0.353553385 : f32
    %86 = vector.broadcast %cst_28 : f32 to vector<8x8xf32>
    %87 = arith.mulf %83, %86 : vector<8x8xf32>
    %88 = arith.truncf %87 : vector<8x8xf32> to vector<8x8xbf16>
    %89 = arith.truncf %84 : vector<8x8xf32> to vector<8x8xbf16>
    %cst_29 = arith.constant dense<0.000000e+00> : vector<8x8xf32>
    %90 = tpu.matmul %88, %89, %cst_29 {dimension_numbers = #tpu.dot_dimension_numbers<[1], [1], [0], [0], [0, 0, 1, 0], [], []>} : vector<8x8xbf16>, vector<8x8xbf16>, vector<8x8xf32> -> vector<8x8xf32>
    %cst_30 = arith.constant 0.000000e+00 : f32
    %91 = vector.broadcast %cst_30 : f32 to vector<8x8xf32>
    %92 = arith.cmpf oeq, %5, %91 : vector<8x8xf32>
    %cst_31 = arith.constant -1.000000e+09 : f32
    %93 = vector.broadcast %cst_31 : f32 to vector<8x8xf32>
    %94 = arith.select %92, %93, %90 : vector<8x8xi1>, vector<8x8xf32>
    %cst_32 = arith.constant dense<0xFF800000> : vector<8xf32>
    %95 = vector.multi_reduction <maximumf>, %94, %cst_32 [1] : vector<8x8xf32> to vector<8xf32>
    %96 = vector.shape_cast %95 : vector<8xf32> to vector<8x1xf32>
    %97 = vector.broadcast %96 : vector<8x1xf32> to vector<8x8xf32>
    %98 = arith.subf %94, %97 : vector<8x8xf32>
    %99 = math.exp %98 : vector<8x8xf32>
    %cst_33 = arith.constant dense<0.000000e+00> : vector<8xf32>
    %100 = vector.multi_reduction <add>, %99, %cst_33 [1] : vector<8x8xf32> to vector<8xf32>
    %101 = vector.shape_cast %100 : vector<8xf32> to vector<8x1xf32>
    %102 = tpu.reciprocal %101 {approx = true} : vector<8x1xf32> -> vector<8x1xf32>
    %103 = vector.broadcast %102 : vector<8x1xf32> to vector<8x8xf32>
    %104 = arith.mulf %99, %103 : vector<8x8xf32>
    %105 = arith.truncf %104 : vector<8x8xf32> to vector<8x8xbf16>
    %106 = arith.truncf %85 : vector<8x8xf32> to vector<8x8xbf16>
    %cst_34 = arith.constant dense<0.000000e+00> : vector<8x8xf32>
    %107 = tpu.matmul %105, %106, %cst_34 {dimension_numbers = #tpu.dot_dimension_numbers<[1], [0], [0], [1], [0, 0, 1, 1], [], []>} : vector<8x8xbf16>, vector<8x8xbf16>, vector<8x8xf32> -> vector<8x8xf32>
    %108 = tpu.concatenate %32, %57, %82, %107 in 1 : vector<8x8xf32>, vector<8x8xf32>, vector<8x8xf32>, vector<8x8xf32> -> vector<8x32xf32>
    %c0_35 = arith.constant 0 : index
    %c0_36 = arith.constant 0 : index
    %c0_37 = arith.constant 0 : index
    %109 = vector.load %arg4[%c0_35, %c0_36, %c0_37] : memref<1x8x32xf32, #tpu.memory_space<vmem>>, vector<1x8x32xf32>
    %110 = vector.shape_cast %109 : vector<1x8x32xf32> to vector<8x32xf32>
    %111 = vector.shape_cast %108 : vector<8x32xf32> to vector<1x8x32xf32>
    tpu.vector_store %arg4[%c0_35, %c0_36, %c0_37], %111 {strides = array<i32>} : memref<1x8x32xf32, #tpu.memory_space<vmem>>, vector<1x8x32xf32>,
    return
  }
  func.func @transform_0(%arg0: i32) -> (i32, i32, i32) {
    %c0_i32 = arith.constant 0 : i32
    %c0_i32_0 = arith.constant 0 : i32
    %c0_i32_1 = arith.constant 0 : i32
    return %arg0, %c0_i32, %c0_i32_0 : i32, i32, i32
  }
  func.func @transform_1(%arg0: i32) -> (i32, i32, i32) {
    %c0_i32 = arith.constant 0 : i32
    %c0_i32_0 = arith.constant 0 : i32
    %c0_i32_1 = arith.constant 0 : i32
    return %arg0, %c0_i32, %c0_i32_0 : i32, i32, i32
  }
  func.func @transform_2(%arg0: i32) -> (i32, i32, i32) {
    %c0_i32 = arith.constant 0 : i32
    %c0_i32_0 = arith.constant 0 : i32
    %c0_i32_1 = arith.constant 0 : i32
    return %arg0, %c0_i32, %c0_i32_0 : i32, i32, i32
  }
  func.func @transform_3(%arg0: i32) -> (i32, i32, i32) {
    %c0_i32 = arith.constant 0 : i32
    %c0_i32_0 = arith.constant 0 : i32
    %c0_i32_1 = arith.constant 0 : i32
    return %arg0, %c0_i32, %c0_i32_0 : i32, i32, i32
  }
}

module attributes {stable_mosaic.version = 11 : i64} {
  func.func @_fused_linear_kernel(%arg0: i32, %arg1: i32, %arg2: memref<16x64xf32, #tpu.memory_space<vmem>>, %arg3: memref<64x32xbf16, #tpu.memory_space<vmem>>, %arg4: memref<1x32xf32, #tpu.memory_space<vmem>>, %arg5: memref<16x32xf32, #tpu.memory_space<vmem>>, %arg6: memref<16x32xf32, #tpu.memory_space<vmem>>) attributes {dimension_semantics = [#tpu.dimension_semantics<parallel>, #tpu.dimension_semantics<parallel>], iteration_bounds = array<i64: 1, 1>, scalar_prefetch = 0 : i64, scratch_operands = 0 : i64, tpu.core_type = #tpu.core_type<tc>, window_params = [{transform_indices = @transform_0, window_bounds = array<i64: 16, 64>}, {transform_indices = @transform_1, window_bounds = array<i64: 64, 32>}, {transform_indices = @transform_2, window_bounds = array<i64: 1, 32>}, {transform_indices = @transform_3, window_bounds = array<i64: 16, 32>}, {transform_indices = @transform_4, window_bounds = array<i64: 16, 32>}]} {
    %c0 = arith.constant 0 : index
    %c0_0 = arith.constant 0 : index
    %0 = vector.load %arg2[%c0, %c0_0] : memref<16x64xf32, #tpu.memory_space<vmem>>, vector<16x64xf32>
    %1 = arith.truncf %0 : vector<16x64xf32> to vector<16x64xbf16>
    %c0_1 = arith.constant 0 : index
    %c0_2 = arith.constant 0 : index
    %2 = vector.load %arg3[%c0_1, %c0_2] : memref<64x32xbf16, #tpu.memory_space<vmem>>, vector<64x32xbf16>
    %cst = arith.constant dense<0.000000e+00> : vector<16x32xf32>
    %3 = tpu.matmul %1, %2, %cst {dimension_numbers = #tpu.dot_dimension_numbers<[1], [0], [0], [1], [0, 0, 1, 1], [], []>} : vector<16x64xbf16>, vector<64x32xbf16>, vector<16x32xf32> -> vector<16x32xf32>
    %c0_3 = arith.constant 0 : index
    %c0_4 = arith.constant 0 : index
    %4 = vector.load %arg4[%c0_3, %c0_4] : memref<1x32xf32, #tpu.memory_space<vmem>>, vector<1x32xf32>
    %5 = vector.broadcast %4 : vector<1x32xf32> to vector<16x32xf32>
    %6 = arith.addf %3, %5 : vector<16x32xf32>
    %c0_5 = arith.constant 0 : index
    %c0_6 = arith.constant 0 : index
    %7 = vector.load %arg5[%c0_5, %c0_6] : memref<16x32xf32, #tpu.memory_space<vmem>>, vector<16x32xf32>
    %8 = arith.addf %6, %7 : vector<16x32xf32>
    %c0_7 = arith.constant 0 : index
    %c0_8 = arith.constant 0 : index
    %9 = vector.load %arg6[%c0_7, %c0_8] : memref<16x32xf32, #tpu.memory_space<vmem>>, vector<16x32xf32>
    tpu.vector_store %arg6[%c0_7, %c0_8], %8 {strides = array<i32>} : memref<16x32xf32, #tpu.memory_space<vmem>>, vector<16x32xf32>,
    return
  }
  func.func @transform_0(%arg0: i32, %arg1: i32) -> (i32, i32) {
    %c0_i32 = arith.constant 0 : i32
    %c0_i32_0 = arith.constant 0 : i32
    return %arg0, %c0_i32 : i32, i32
  }
  func.func @transform_1(%arg0: i32, %arg1: i32) -> (i32, i32) {
    %c0_i32 = arith.constant 0 : i32
    %c0_i32_0 = arith.constant 0 : i32
    return %c0_i32, %arg1 : i32, i32
  }
  func.func @transform_2(%arg0: i32, %arg1: i32) -> (i32, i32) {
    %c0_i32 = arith.constant 0 : i32
    %c0_i32_0 = arith.constant 0 : i32
    return %c0_i32, %arg1 : i32, i32
  }
  func.func @transform_3(%arg0: i32, %arg1: i32) -> (i32, i32) {
    %c0_i32 = arith.constant 0 : i32
    return %arg0, %arg1 : i32, i32
  }
  func.func @transform_4(%arg0: i32, %arg1: i32) -> (i32, i32) {
    %c0_i32 = arith.constant 0 : i32
    return %arg0, %arg1 : i32, i32
  }
}

module attributes {stable_mosaic.version = 11 : i64} {
  func.func @_layernorm_kernel(%arg0: i32, %arg1: memref<16x32xf32, #tpu.memory_space<vmem>>, %arg2: memref<1x32xf32, #tpu.memory_space<vmem>>, %arg3: memref<1x32xf32, #tpu.memory_space<vmem>>, %arg4: memref<16x32xf32, #tpu.memory_space<vmem>>) attributes {dimension_semantics = [#tpu.dimension_semantics<parallel>], iteration_bounds = array<i64: 1>, scalar_prefetch = 0 : i64, scratch_operands = 0 : i64, tpu.core_type = #tpu.core_type<tc>, window_params = [{transform_indices = @transform_0, window_bounds = array<i64: 16, 32>}, {pipeline_mode = #tpu.pipeline_mode<synchronous>, transform_indices = @transform_1, window_bounds = array<i64: 1, 32>}, {pipeline_mode = #tpu.pipeline_mode<synchronous>, transform_indices = @transform_2, window_bounds = array<i64: 1, 32>}, {transform_indices = @transform_3, window_bounds = array<i64: 16, 32>}]} {
    %c0 = arith.constant 0 : index
    %c0_0 = arith.constant 0 : index
    %0 = vector.load %arg1[%c0, %c0_0] : memref<16x32xf32, #tpu.memory_space<vmem>>, vector<16x32xf32>
    %cst = arith.constant dense<0.000000e+00> : vector<16xf32>
    %1 = vector.multi_reduction <add>, %0, %cst [1] : vector<16x32xf32> to vector<16xf32>
    %2 = vector.shape_cast %1 : vector<16xf32> to vector<16x1xf32>
    %cst_1 = arith.constant 3.200000e+01 : f32
    %3 = vector.broadcast %cst_1 : f32 to vector<16x1xf32>
    %4 = arith.divf %2, %3 : vector<16x1xf32>
    %5 = vector.broadcast %4 : vector<16x1xf32> to vector<16x32xf32>
    %6 = arith.subf %0, %5 : vector<16x32xf32>
    %7 = arith.mulf %6, %6 : vector<16x32xf32>
    %cst_2 = arith.constant dense<0.000000e+00> : vector<16xf32>
    %8 = vector.multi_reduction <add>, %7, %cst_2 [1] : vector<16x32xf32> to vector<16xf32>
    %9 = vector.shape_cast %8 : vector<16xf32> to vector<16x1xf32>
    %cst_3 = arith.constant 3.100000e+01 : f32
    %10 = vector.broadcast %cst_3 : f32 to vector<16x1xf32>
    %11 = arith.divf %9, %10 : vector<16x1xf32>
    %12 = math.sqrt %11 : vector<16x1xf32>
    %c0_4 = arith.constant 0 : index
    %c0_5 = arith.constant 0 : index
    %13 = vector.load %arg2[%c0_4, %c0_5] : memref<1x32xf32, #tpu.memory_space<vmem>>, vector<1x32xf32>
    %14 = vector.broadcast %13 : vector<1x32xf32> to vector<16x32xf32>
    %15 = arith.mulf %14, %6 : vector<16x32xf32>
    %cst_6 = arith.constant 9.99999997E-7 : f32
    %16 = vector.broadcast %cst_6 : f32 to vector<16x1xf32>
    %17 = arith.addf %12, %16 : vector<16x1xf32>
    %18 = tpu.reciprocal %17 {approx = true} : vector<16x1xf32> -> vector<16x1xf32>
    %19 = vector.broadcast %18 : vector<16x1xf32> to vector<16x32xf32>
    %20 = arith.mulf %15, %19 : vector<16x32xf32>
    %c0_7 = arith.constant 0 : index
    %c0_8 = arith.constant 0 : index
    %21 = vector.load %arg3[%c0_7, %c0_8] : memref<1x32xf32, #tpu.memory_space<vmem>>, vector<1x32xf32>
    %22 = vector.broadcast %21 : vector<1x32xf32> to vector<16x32xf32>
    %23 = arith.addf %20, %22 : vector<16x32xf32>
    %c0_9 = arith.constant 0 : index
    %c0_10 = arith.constant 0 : index
    %24 = vector.load %arg4[%c0_9, %c0_10] : memref<16x32xf32, #tpu.memory_space<vmem>>, vector<16x32xf32>
    tpu.vector_store %arg4[%c0_9, %c0_10], %23 {strides = array<i32>} : memref<16x32xf32, #tpu.memory_space<vmem>>, vector<16x32xf32>,
    return
  }
  func.func @transform_0(%arg0: i32) -> (i32, i32) {
    %c0_i32 = arith.constant 0 : i32
    %c0_i32_0 = arith.constant 0 : i32
    return %arg0, %c0_i32 : i32, i32
  }
  func.func @transform_1(%arg0: i32) -> (i32, i32) {
    %c0_i32 = arith.constant 0 : i32
    %c0_i32_0 = arith.constant 0 : i32
    %c0_i32_1 = arith.constant 0 : i32
    return %c0_i32, %c0_i32_0 : i32, i32
  }
  func.func @transform_2(%arg0: i32) -> (i32, i32) {
    %c0_i32 = arith.constant 0 : i32
    %c0_i32_0 = arith.constant 0 : i32
    %c0_i32_1 = arith.constant 0 : i32
    return %c0_i32, %c0_i32_0 : i32, i32
  }
  func.func @transform_3(%arg0: i32) -> (i32, i32) {
    %c0_i32 = arith.constant 0 : i32
    %c0_i32_0 = arith.constant 0 : i32
    return %arg0, %c0_i32 : i32, i32
  }
}

</mosaic_0001>

<bundles_post_ra>
// kernel: decoder_forward.21
= control target key start
LH: loop header
LB: loop body
LE: loop exit
PB: predicated region body
PF: predicated region fallthrough
CT: control target
= control target key end

     0   :  { %vm41_vm0 = vcmask 261120   ;;  %s133_s1 = inlined_call_operand.vmem [shape: bf16[32,32], index: 1, kind: input, shape index: {}]   ;;  %s134_s0 = inlined_call_operand.vmem [shape: f32[16,32], index: 0, kind: input, shape index: {}]   ;;  %s135_s2 = inlined_call_operand.vmem [shape: f32[1,32], index: 2, kind: input, shape index: {}]   ;;  %s136_s3 = inlined_call_operand.vmem [shape: f32[16,32], index: 3, kind: input, shape index: {}]   ;;  %s137_s4 = inlined_call_operand.vmem [shape: f32[16,32], index: 4, kind: output, shape index: {}]  }
   0x1   :  { %v79_v0 = vld [vmem:[%s133_s1 + $0x8] sm:$0xff]  ;;  %v78_v1 = vld [vmem:[%s133_s1] sm:$0xff] }
   0x2   :  { %51 = vmatpush.bf16.msra.mxu0 %v79_v0  ;;  %v18_v2 = vld [vmem:[%s134_s0] sm:$0xff]  ;;  %v19_v3 = vld [vmem:[%s134_s0 + $0x8] sm:$0xff] }
   0x3   :  { %v20_v4 = vpack.c.bf16 %v19_v3, %v18_v2  ;;  %v80_v5 = vld [vmem:[%s135_s2] ss:$0 sm:$0xff]  ;;  %v60_v11 = vld [vmem:[%s136_s3 + $0x8] sm:$0xff] }
   0x4   :  { %v59_v7 = vld [vmem:[%s136_s3] sm:$0xff] }
   0x6   :  { %52 = vmatpush.bf16.msra.mxu0 %v78_v1 }
   0x9   :  { %77 = vmatmul.msk.bf16.vlgmr.msra.gmra.mxu0 %vm41_vm0, %v20_v4 }
  0x86   :  { %v54_v6 = vpop.f32.mrf.mxu0 }
  0x87   :  { %v55_v8 = vadd.f32 %v80_v5, %v54_v6 }
  0x89   :  { %v61_v9 = vadd.f32 %v59_v7, %v55_v8 }
  0x8b   :  { %63 = vst.msk [vmem:[%s137_s4] sm:$0xff] %vm41_vm0, %v61_v9 }
  0x8e   :  { %v56_v10 = vpop.f32.mrf.mxu0 }
  0x8f   :  { %v57_v12 = vadd.f32 %v80_v5, %v56_v10 }
  0x91   :  { %v62_v13 = vadd.f32 %v60_v11, %v57_v12 }
  0x93   :  { %64 = vst.msk [vmem:[%s137_s4 + $0x8] sm:$0xff] %vm41_vm0, %v62_v13 }

// kernel: decoder_forward.22
= control target key start
LH: loop header
LB: loop body
LE: loop exit
PB: predicated region body
PF: predicated region fallthrough
CT: control target
= control target key end

     0   :  { %vm23_vm0 = vcmask 261120   ;;  %v172_v4 = vmov 32.0   ;;  %v173_v24 = vmov 31.0   ;;  %s238_s0 = inlined_call_operand.vmem [shape: f32[16,32], index: 0, kind: input, shape index: {}]   ;;  %s239_s1 = inlined_call_operand.vmem [shape: f32[1,32], index: 1, kind: input, shape index: {}]   ;;  %s240_s2 = inlined_call_operand.vmem [shape: f32[1,32], index: 2, kind: input, shape index: {}]   ;;  %s241_s4 = inlined_call_operand.vmem [shape: f32[1,32], index: 4, kind: input, shape index: {}]   ;;  %s242_s3 = inlined_call_operand.vmem [shape: bf16[32,32], index: 3, kind: input, shape index: {}]   ;;  %s243_s5 = inlined_call_operand.vmem [shape: f32[16,32], index: 5, kind: output, shape index: {}]  }
   0x1   :  { %v21_v0 = vld [vmem:[%s238_s0] sm:$0xff]  ;;  %v22_v2 = vld [vmem:[%s238_s0 + $0x8] sm:$0xff]  ;;  %160 = vrcp.f32 %v172_v4 }
   0x2   :  { %v24_v1 = vsel %vm23_vm0, %v21_v0, 0.0  ;;  %v27_v3 = vsel %vm23_vm0, %v22_v2, 0.0  ;;  %v157_v12 = vld [vmem:[%s239_s1] ss:$0 sm:$0xff]  ;;  %162 = vrcp.f32 %v173_v24  ;;  %v154_v28 = vld [vmem:[%s242_s3 + $0x8] sm:$0xff] }
   0x3   :  { %25 = vadd.xlane.f32.xlu0 %v24_v1  ;;  %130 = vmatpush.bf16.msra.mxu0 %v154_v28  ;;  %v153_v30 = vld [vmem:[%s242_s3] sm:$0xff] }
   0x4   :  { %v158_v61 = vld [vmem:[%s240_s2] ss:$0 sm:$0xff] }
   0x7   :  { %v161_v5 = vpop.eup %160  ;;  %131 = vmatpush.bf16.msra.mxu0 %v153_v30 }
   0x8   :  { %v31_v6 = vmul.f32 32.0, %v161_v5  ;;  %vm35_vm1 = vweird.f32 %v161_v5  ;;  %v163_v25 = vpop.eup %162 }
   0x9   :  { %v50_v26 = vmul.f32 31.0, %v163_v25  ;;  %vm54_vm2 = vweird.f32 %v163_v25 }
   0xa   :  { %v32_v7 = vsub.f32 1.0, %v31_v6 }
   0xb   :  { %28 = vadd.xlane.f32.xlu0 %v27_v3  ;;  %v51_v27 = vsub.f32 1.0, %v50_v26  ;;  %v159_v3 = vld [vmem:[%s241_s4] ss:$0 sm:$0xff] }
   0xc   :  { %v33_v8 = vmul.f32 %v161_v5, %v32_v7 }
   0xd   :  { %v52_v29 = vmul.f32 %v163_v25, %v51_v27 }
   0xe   :  { %v34_v9 = vadd.f32 %v161_v5, %v33_v8 }
   0xf   :  { %v53_v31 = vadd.f32 %v163_v25, %v52_v29 }
  0x10   :  { %v36_v10 = vsel %vm35_vm1, %v161_v5, %v34_v9 }
  0x11   :  { %v55_v32 = vsel %vm54_vm2, %v163_v25, %v53_v31 }
  0x76   :  { %v26_v11 = vpop.xlane.xlu0 %25 }
  0x77   :  { %v37_v13 = vmul.f32 %v36_v10, %v26_v11 }
  0x79   :  { %v39_v14 = vsub.f32 %v21_v0, %v37_v13 }
  0x7b   :  { %v86_v15 = vmul.f32 %v157_v12, %v39_v14  ;;  %v41_v16 = vmul.f32 %v39_v14, %v39_v14 }
  0x7d   :  { %v43_v17 = vsel %vm23_vm0, %v41_v16, 0.0 }
  0x7e   :  { %44 = vadd.xlane.f32.xlu1 %v43_v17  ;;  %v29_v18 = vpop.xlane.xlu0 %28 }
  0x7f   :  { %v38_v19 = vmul.f32 %v36_v10, %v29_v18 }
  0x81   :  { %v40_v20 = vsub.f32 %v22_v2, %v38_v19 }
  0x83   :  { %v87_v21 = vmul.f32 %v157_v12, %v40_v20  ;;  %v42_v22 = vmul.f32 %v40_v20, %v40_v20 }
  0x85   :  { %v46_v23 = vsel %vm23_vm0, %v42_v22, 0.0 }
  0x86   :  { %47 = vadd.xlane.f32.xlu1 %v46_v23 }
  0xf1   :  { %v45_v33 = vpop.xlane.xlu1 %44 }
  0xf2   :  { %v56_v34 = vmul.f32 %v55_v32, %v45_v33 }
  0xf4   :  { %164 = vrsqrt.f32 %v56_v34  ;;  %vm65_vm3 = vcmp.eq.f32.partialorder %v56_v34, inf  ;;  %v68_v47 = vand.u32 2147483648, %v56_v34  ;;  %vm67_vm4 = vcmp.eq.f32.partialorder %v56_v34, 0.0 }
  0xf9   :  { %v48_v35 = vpop.xlane.xlu1 %47 }
  0xfa   :  { %v165_v36 = vpop.eup %164  ;;  %v57_v37 = vmul.f32 %v55_v32, %v48_v35 }
  0xfb   :  { %v59_v38 = vmul.f32 %v165_v36, %v56_v34 }
  0xfc   :  { %166 = vrsqrt.f32 %v57_v37  ;;  %vm77_vm5 = vcmp.eq.f32.partialorder %v57_v37, inf  ;;  %v80_v55 = vand.u32 2147483648, %v57_v37  ;;  %vm79_vm6 = vcmp.eq.f32.partialorder %v57_v37, 0.0 }
  0xfd   :  { %v60_v39 = vmul.f32 %v165_v36, %v59_v38 }
  0xff   :  { %v61_v40 = vmul.f32 0.5, %v60_v39 }
 0x101   :  { %v62_v41 = vsub.f32 1.5, %v61_v40 }
 0x102   :  { %v167_v42 = vpop.eup %166 }
 0x103   :  { %v71_v43 = vmul.f32 %v167_v42, %v57_v37  ;;  %v63_v44 = vmul.f32 %v165_v36, %v62_v41 }
 0x105   :  { %v72_v45 = vmul.f32 %v167_v42, %v71_v43  ;;  %v64_v46 = vmul.f32 %v63_v44, %v56_v34 }
 0x107   :  { %v66_v48 = vsel %vm65_vm3, %v56_v34, %v64_v46  ;;  %v73_v49 = vmul.f32 0.5, %v72_v45 }
 0x108   :  { %v69_v50 = vsel %vm67_vm4, %v68_v47, %v66_v48 }
 0x109   :  { %v74_v51 = vsub.f32 1.5, %v73_v49  ;;  %v88_v53 = vadd.f32 1e-06, %v69_v50 }
 0x10b   :  { %v75_v52 = vmul.f32 %v167_v42, %v74_v51  ;;  %168 = vrcp.f32 %v88_v53 }
 0x10d   :  { %v76_v54 = vmul.f32 %v75_v52, %v57_v37 }
 0x10f   :  { %v78_v56 = vsel %vm77_vm5, %v57_v37, %v76_v54 }
 0x110   :  { %v81_v57 = vsel %vm79_vm6, %v80_v55, %v78_v56 }
 0x111   :  { %v89_v58 = vadd.f32 1e-06, %v81_v57  ;;  %v169_v59 = vpop.eup %168 }
 0x112   :  { %v92_v60 = vmul.f32 %v169_v59, %v86_v15 }
 0x113   :  { %170 = vrcp.f32 %v89_v58 }
 0x114   :  { %v98_v0 = vadd.f32 %v158_v61, %v92_v60 }
 0x119   :  { %v171_v62 = vpop.eup %170 }
 0x11a   :  { %v93_v63 = vmul.f32 %v171_v62, %v87_v21 }
 0x11c   :  { %v99_v1 = vadd.f32 %v158_v61, %v93_v63 }
 0x11e   :  { %v100_v2 = vpack.c.bf16 %v99_v1, %v98_v0 }
 0x120   :  { %152 = vmatmul.msk.bf16.vlgmr.msra.gmra.mxu0 %vm23_vm0, %v100_v2 }
 0x19d   :  { %v133_v4 = vpop.f32.mrf.mxu0 }
 0x19e   :  { %v134_v5 = vadd.f32 %v159_v3, %v133_v4 }
 0x1a0   :  { %138 = vst.msk [vmem:[%s243_s5] sm:$0xff] %vm23_vm0, %v134_v5 }
 0x1a5   :  { %v135_v6 = vpop.f32.mrf.mxu0 }
 0x1a6   :  { %v136_v7 = vadd.f32 %v159_v3, %v135_v6 }
 0x1a8   :  { %139 = vst.msk [vmem:[%s243_s5 + $0x8] sm:$0xff] %vm23_vm0, %v136_v7 }

// kernel: decoder_forward.19
= control target key start
LH: loop header
LB: loop body
LE: loop exit
PB: predicated region body
PF: predicated region fallthrough
CT: control target
= control target key end

     0   :  { %vm23_vm0 = vcmask 261120   ;;  %v173_v4 = vmov 32.0   ;;  %v174_v24 = vmov 31.0   ;;  %vm138_vm7 = vcmask 785408   ;;  %s237_s0 = inlined_call_operand.vmem [shape: f32[16,32], index: 0, kind: input, shape index: {}]   ;;  %s238_s1 = inlined_call_operand.vmem [shape: f32[1,32], index: 1, kind: input, shape index: {}]   ;;  %s239_s2 = inlined_call_operand.vmem [shape: f32[1,32], index: 2, kind: input, shape index: {}]   ;;  %s240_s4 = inlined_call_operand.vmem [shape: f32[1,96], index: 4, kind: input, shape index: {}]   ;;  %s241_s3 = inlined_call_operand.vmem [shape: bf16[32,96], index: 3, kind: input, shape index: {}]   ;;  %s242_s5 = inlined_call_operand.vmem [shape: f32[16,96], index: 5, kind: output, shape index: {}]  }
   0x1   :  { %v21_v0 = vld [vmem:[%s237_s0] sm:$0xff]  ;;  %v22_v2 = vld [vmem:[%s237_s0 + $0x8] sm:$0xff]  ;;  %161 = vrcp.f32 %v173_v4 }
   0x2   :  { %v24_v1 = vsel %vm23_vm0, %v21_v0, 0.0  ;;  %v27_v3 = vsel %vm23_vm0, %v22_v2, 0.0  ;;  %v158_v12 = vld [vmem:[%s238_s1] ss:$0 sm:$0xff]  ;;  %163 = vrcp.f32 %v174_v24  ;;  %v155_v28 = vld [vmem:[%s241_s3 + $0x8] sm:$0xff] }
   0x3   :  { %25 = vadd.xlane.f32.xlu0 %v24_v1  ;;  %130 = vmatpush.bf16.msra.mxu0 %v155_v28  ;;  %v154_v30 = vld [vmem:[%s241_s3] sm:$0xff] }
   0x4   :  { %v159_v61 = vld [vmem:[%s239_s2] ss:$0 sm:$0xff] }
   0x7   :  { %v162_v5 = vpop.eup %161  ;;  %131 = vmatpush.bf16.msra.mxu0 %v154_v30 }
   0x8   :  { %v31_v6 = vmul.f32 32.0, %v162_v5  ;;  %vm35_vm1 = vweird.f32 %v162_v5  ;;  %v164_v25 = vpop.eup %163 }
   0x9   :  { %v50_v26 = vmul.f32 31.0, %v164_v25  ;;  %vm54_vm2 = vweird.f32 %v164_v25 }
   0xa   :  { %v32_v7 = vsub.f32 1.0, %v31_v6 }
   0xb   :  { %28 = vadd.xlane.f32.xlu0 %v27_v3  ;;  %v51_v27 = vsub.f32 1.0, %v50_v26  ;;  %v160_v3 = vld [vmem:[%s240_s4] ss:$0 sm:$0xff] }
   0xc   :  { %v33_v8 = vmul.f32 %v162_v5, %v32_v7 }
   0xd   :  { %v52_v29 = vmul.f32 %v164_v25, %v51_v27 }
   0xe   :  { %v34_v9 = vadd.f32 %v162_v5, %v33_v8 }
   0xf   :  { %v53_v31 = vadd.f32 %v164_v25, %v52_v29 }
  0x10   :  { %v36_v10 = vsel %vm35_vm1, %v162_v5, %v34_v9 }
  0x11   :  { %v55_v32 = vsel %vm54_vm2, %v164_v25, %v53_v31 }
  0x76   :  { %v26_v11 = vpop.xlane.xlu0 %25 }
  0x77   :  { %v37_v13 = vmul.f32 %v36_v10, %v26_v11 }
  0x79   :  { %v39_v14 = vsub.f32 %v21_v0, %v37_v13 }
  0x7b   :  { %v86_v15 = vmul.f32 %v158_v12, %v39_v14  ;;  %v41_v16 = vmul.f32 %v39_v14, %v39_v14 }
  0x7d   :  { %v43_v17 = vsel %vm23_vm0, %v41_v16, 0.0 }
  0x7e   :  { %44 = vadd.xlane.f32.xlu1 %v43_v17  ;;  %v29_v18 = vpop.xlane.xlu0 %28 }
  0x7f   :  { %v38_v19 = vmul.f32 %v36_v10, %v29_v18 }
  0x81   :  { %v40_v20 = vsub.f32 %v22_v2, %v38_v19 }
  0x83   :  { %v87_v21 = vmul.f32 %v158_v12, %v40_v20  ;;  %v42_v22 = vmul.f32 %v40_v20, %v40_v20 }
  0x85   :  { %v46_v23 = vsel %vm23_vm0, %v42_v22, 0.0 }
  0x86   :  { %47 = vadd.xlane.f32.xlu1 %v46_v23 }
  0xf1   :  { %v45_v33 = vpop.xlane.xlu1 %44 }
  0xf2   :  { %v56_v34 = vmul.f32 %v55_v32, %v45_v33 }
  0xf4   :  { %165 = vrsqrt.f32 %v56_v34  ;;  %vm65_vm3 = vcmp.eq.f32.partialorder %v56_v34, inf  ;;  %v68_v47 = vand.u32 2147483648, %v56_v34  ;;  %vm67_vm4 = vcmp.eq.f32.partialorder %v56_v34, 0.0 }
  0xf9   :  { %v48_v35 = vpop.xlane.xlu1 %47 }
  0xfa   :  { %v166_v36 = vpop.eup %165  ;;  %v57_v37 = vmul.f32 %v55_v32, %v48_v35 }
  0xfb   :  { %v59_v38 = vmul.f32 %v166_v36, %v56_v34 }
  0xfc   :  { %167 = vrsqrt.f32 %v57_v37  ;;  %vm77_vm5 = vcmp.eq.f32.partialorder %v57_v37, inf  ;;  %v80_v55 = vand.u32 2147483648, %v57_v37  ;;  %vm79_vm6 = vcmp.eq.f32.partialorder %v57_v37, 0.0 }
  0xfd   :  { %v60_v39 = vmul.f32 %v166_v36, %v59_v38 }
  0xff   :  { %v61_v40 = vmul.f32 0.5, %v60_v39 }
 0x101   :  { %v62_v41 = vsub.f32 1.5, %v61_v40 }
 0x102   :  { %v168_v42 = vpop.eup %167 }
 0x103   :  { %v71_v43 = vmul.f32 %v168_v42, %v57_v37  ;;  %v63_v44 = vmul.f32 %v166_v36, %v62_v41 }
 0x105   :  { %v72_v45 = vmul.f32 %v168_v42, %v71_v43  ;;  %v64_v46 = vmul.f32 %v63_v44, %v56_v34 }
 0x107   :  { %v66_v48 = vsel %vm65_vm3, %v56_v34, %v64_v46  ;;  %v73_v49 = vmul.f32 0.5, %v72_v45 }
 0x108   :  { %v69_v50 = vsel %vm67_vm4, %v68_v47, %v66_v48 }
 0x109   :  { %v74_v51 = vsub.f32 1.5, %v73_v49  ;;  %v88_v53 = vadd.f32 1e-06, %v69_v50 }
 0x10b   :  { %v75_v52 = vmul.f32 %v168_v42, %v74_v51  ;;  %169 = vrcp.f32 %v88_v53 }
 0x10d   :  { %v76_v54 = vmul.f32 %v75_v52, %v57_v37 }
 0x10f   :  { %v78_v56 = vsel %vm77_vm5, %v57_v37, %v76_v54 }
 0x110   :  { %v81_v57 = vsel %vm79_vm6, %v80_v55, %v78_v56 }
 0x111   :  { %v89_v58 = vadd.f32 1e-06, %v81_v57  ;;  %v170_v59 = vpop.eup %169 }
 0x112   :  { %v92_v60 = vmul.f32 %v170_v59, %v86_v15 }
 0x113   :  { %171 = vrcp.f32 %v89_v58 }
 0x114   :  { %v98_v0 = vadd.f32 %v159_v61, %v92_v60 }
 0x119   :  { %v172_v62 = vpop.eup %171 }
 0x11a   :  { %v93_v63 = vmul.f32 %v172_v62, %v87_v21 }
 0x11c   :  { %v99_v1 = vadd.f32 %v159_v61, %v93_v63 }
 0x11e   :  { %v100_v2 = vpack.c.bf16 %v99_v1, %v98_v0 }
 0x120   :  { %153 = vmatmul.msk.bf16.vlgmr.msra.gmra.mxu0 %vm23_vm0, %v100_v2 }
 0x19d   :  { %v133_v4 = vpop.f32.mrf.mxu0 }
 0x19e   :  { %v134_v5 = vadd.f32 %v160_v3, %v133_v4 }
 0x1a0   :  { %139 = vst.msk [vmem:[%s242_s5] sm:$0xff] %vm138_vm7, %v134_v5 }
 0x1a5   :  { %v135_v6 = vpop.f32.mrf.mxu0 }
 0x1a6   :  { %v136_v7 = vadd.f32 %v160_v3, %v135_v6 }
 0x1a8   :  { %140 = vst.msk [vmem:[%s242_s5 + $0x8] sm:$0xff] %vm138_vm7, %v136_v7 }

// kernel: decoder_forward.20
= control target key start
LH: loop header
LB: loop body
LE: loop exit
PB: predicated region body
PF: predicated region fallthrough
CT: control target
= control target key end

     0   :  { %s806_s15 = smov 0   ;;  %s951_s0 = inlined_call_operand.vmem [shape: f32[2,8,96], index: 0, kind: input, shape index: {}]   ;;  %s952_s1 = inlined_call_operand.vmem [shape: f32[2,8,8], index: 1, kind: input, shape index: {}]   ;;  %s953_s2 = inlined_call_operand.vmem [shape: f32[8,8], index: 2, kind: input, shape index: {}]   ;;  %s954_s3 = inlined_call_operand.vmem [shape: f32[8,8], index: 3, kind: input, shape index: {}]   ;;  %s955_s4 = inlined_call_operand.vmem [shape: f32[2,8,32], index: 4, kind: output, shape index: {}]  }
   0x1 LB: > { %s683_s16 = sadd.s32 4294967295, %s755_s15   ;;  %p687_p0 = scmp.ge.s32.totalorder %s755_s15, 1  ;;  %s755_s15 = sphi %s806_s15, %s14_s15  }
   0x2   : > { %p170_p1 = scmp.lt.s32.totalorder %s755_s15, 3 }
   0x4   : > { %p171_p2 = pnand %p687_p0, %p170_p1 }
   0x5   : > { %p198_p3 = scmp.lt.s32.totalorder (!%p171_p2), %s683_s16, 1  ;;  %s757_s21 = smov (!%p171_p2), 92  }
   0x6   : > { %174 = sbr.rel (%p171_p2) target bundleno = 1433 (0x599), region = 36  ;;  %s758_s22 = smov (!%p171_p2), 100  }
   0x7   : > { %s759_s25 = smov (!%p171_p2), 32   ;;  %s760_s26 = smov (!%p171_p2), 124  }
   0x8   : > { %s761_s29 = smov (!%p171_p2), 4   ;;  %s762_s30 = smov (!%p171_p2), 84  }
   0x9   : > { %s763_s5 = smov (!%p171_p2), 68   ;;  %s764_s6 = smov (!%p171_p2), 116  }
   0xa   : > { %s765_s7 = smov (!%p171_p2), 76   ;;  %s766_s8 = smov (!%p171_p2), 96  }
   0xb   : > { %s957_s16 = smov (!%p198_p3, %s683_s16), 1  ;;  %v828_v2 = vld [vmem:[%s953_s2] sm:$0xff]  ;;  %vm224_vm0 = vcmask 31744   ;;  %s767_s9 = smov 40   ;;  %vm253_vm1 = vcmask 64512   ;;  %vm294_vm3 = vcmask 1043456  }
   0xc   : > { %s814_s17 = sshll.u32 %s957_s16, 3  ;;  %237 = vrot.lane.b32.xlu1 %v828_v2, %s759_s25  ;;  %v834_v4 = vld [vmem:[%s954_s3] sm:$0xff]  ;;  %s768_s10 = smov 8   ;;  %vm612_vm4 = vcmask 130048   ;;  %vm614_vm5 = vcmask 195584   ;;  %vm616_vm6 = vcmask 261120  }
   0xd   : > { %s201_s20 = scalar_lea.vmem %s951_s0, %s814_s17  ;;  %s769_s11 = smov 108  }
   0xe   : > { %v820_v0 = vld [vmem:[%s201_s20] sm:$0xff]  ;;  %s770_s12 = smov 56   ;;  %s771_s13 = smov 48  }
   0xf   : > { %v215_v1 = vsub.f32 0.0, %v820_v0  ;;  %v226_v20 = vmul.f32 %v820_v0, %v828_v2  ;;  %s772_s14 = smov 24   ;;  %s773_s16 = smov 16  }
  0x10   : > { %s774_s18 = smov 88   ;;  %s776_s23 = smov 80  }
  0x11   : > { %229 = vrot.lane.b32.xlu0 %v215_v1, %s757_s21  ;;  %217 = vrot.lane.b32.xlu2 %v215_v1, %s760_s26  ;;  %s777_s24 = smov 64   ;;  %s780_s27 = smov 104  }
  0x19   : > { %232 = vrot.lane.b32.xlu0 %v820_v0, %s758_s22  ;;  %221 = vrot.lane.b32.xlu2 %v820_v0, %s761_s29 }
  0x21   : > { %331 = vrot.lane.b32.xlu2 %v820_v0, %s757_s21  ;;  %s205_s21 = scalar_lea.vmem %s952_s1, %s814_s17 }
  0x22   : > { %v884_v53 = vld [vmem:[%s205_s21] sm:$0xff] }
  0x23   : > { %vm273_vm2 = vcmp.eq.f32.partialorder %v884_v53, 0.0 }
  0x29   : > { %424 = vrot.lane.b32.xlu2 %v215_v1, %s765_s7 }
  0x31   : > { %523 = vrot.lane.b32.xlu2 %v820_v0, %s765_s7 }
  0x39   : > { %503 = vrot.lane.b32.xlu2 %v215_v1, %s758_s22  ;;  %s775_s22 = smov 120  }
  0x41   : > { %335 = vrot.lane.b32.xlu2 %v828_v2, %s767_s9 }
  0x49   : > { %318 = vrot.lane.b32.xlu2 %v828_v2, %s768_s10 }
  0x51   : > { %431 = vrot.lane.b32.xlu2 %v828_v2, %s771_s13 }
  0x6b   : > { %v218_v13 = vpop.permute.xlu2 %217 }
  0x73   : > { %v222_v14 = vpop.permute.xlu2 %221 }
  0x74   : > { %v225_v19 = vsel %vm224_vm0, %v218_v13, %v222_v14 }
  0x75   : > { %v227_v21 = vmul.f32 %v225_v19, %v834_v4 }
  0x77   : > { %v228_v22 = vadd.f32 %v227_v21, %v226_v20 }
  0x79   : > { %v247_v25 = vmul.f32 0.35355338, %v228_v22 }
  0x7b   : > { %v332_v15 = vpop.permute.xlu2 %331  ;;  %v248_v27 = vpack.c.bf16 %v247_v25, %v247_v25 }
  0x7e   : > { %v238_v8 = vpop.permute.xlu1 %237 }
  0x7f   : > { %v240_v9 = vmul.f32 %v238_v8, %v820_v0 }
  0x83   : > { %v230_v3 = vpop.permute.xlu0 %229  ;;  %v425_v31 = vpop.permute.xlu2 %424 }
  0x8b   : > { %v233_v5 = vpop.permute.xlu0 %232  ;;  %v524_v34 = vpop.permute.xlu2 %523 }
  0x8c   : > { %v235_v6 = vsel %vm224_vm0, %v230_v3, %v233_v5 }
  0x8d   : > { %v241_v7 = vmul.f32 %v235_v6, %v834_v4 }
  0x8f   : > { %243 = vrot.lane.b32.xlu1 %v241_v7, %s759_s25  ;;  %s778_s25 = smov 72  }
  0x93   : > { %v504_v39 = vpop.permute.xlu2 %503 }
  0x97   : > { %328 = vrot.lane.b32.xlu1 %v215_v1, %s762_s30 }
  0x9b   : > { %v336_v43 = vpop.permute.xlu2 %335 }
  0x9c   : > { %v338_v44 = vmul.f32 %v336_v43, %v820_v0 }
  0x9f   : > { %314 = vrot.lane.b32.xlu1 %v820_v0, %s760_s26  ;;  %s779_s26 = smov 112  }
  0xa3   : > { %v319_v48 = vpop.permute.xlu2 %318 }
  0xa4   : > { %v321_v49 = vmul.f32 %v319_v48, %v820_v0 }
  0xa7   : > { %520 = vrot.lane.b32.xlu1 %v215_v1, %s763_s5 }
  0xab   : > { %v432_v6 = vpop.permute.xlu2 %431 }
  0xac   : > { %v434_v8 = vmul.f32 %v432_v6, %v820_v0 }
  0xaf   : > { %410 = vrot.lane.b32.xlu1 %v820_v0, %s764_s6 }
 0x101   : > { %v244_v10 = vpop.permute.xlu1 %243 }
 0x102   : > { %v246_v11 = vadd.f32 %v244_v10, %v240_v9 }
 0x104   : > { %v249_v12 = vpack.c.bf16 %v246_v11, %v246_v11 }
 0x106   : > { %251 = vrot.lane.b32.xlu0 %v249_v12, %s766_s8 }
 0x109   : > { %v329_v16 = vpop.permute.xlu1 %328 }
 0x10a   : > { %v334_v17 = vsel %vm224_vm0, %v329_v16, %v332_v15 }
 0x10b   : > { %v339_v18 = vmul.f32 %v334_v17, %v834_v4 }
 0x10e   : > { %311 = vrot.lane.b32.xlu0 %v215_v1, %s764_s6 }
 0x111   : > { %v315_v26 = vpop.permute.xlu1 %314 }
 0x116   : > { %427 = vrot.lane.b32.xlu0 %v820_v0, %s762_s30  ;;  %s209_s30 = scalar_lea.vmem %s955_s4, %s814_s17 }
 0x119   : > { %v521_v33 = vpop.permute.xlu1 %520 }
 0x11a   : > { %v526_v35 = vsel %vm224_vm0, %v521_v33, %v524_v34 }
 0x11b   : > { %v531_v37 = vmul.f32 %v526_v35, %v834_v4 }
 0x11e   : > { %407 = vrot.lane.b32.xlu0 %v215_v1, %s769_s11 }
 0x121   : > { %v411_v54 = vpop.permute.xlu1 %410 }
 0x126   : > { %506 = vrot.lane.b32.xlu0 %v820_v0, %s769_s11 }
 0x12e   : > { %341 = vrot.lane.b32.xlu0 %v339_v18, %s767_s9 }
 0x178   : > { %v252_v23 = vpop.permute.xlu0 %251 }
 0x179   : > { %v258_v24 = vsel %vm253_vm1, %v252_v23, 0 }
 0x17a   : > { %267 = vmatpush.bf16.xpose.msra.mxu0 %v258_v24 }
 0x180   : > { %v312_v28 = vpop.permute.xlu0 %311 }
 0x181   : > { %691 = vmatmul.msk.bf16.vlgmr.msra.gmra.mxu0 %vm253_vm1, %v248_v27  ;;  %v317_v29 = vsel %vm224_vm0, %v312_v28, %v315_v26 }
 0x182   : > { %v322_v30 = vmul.f32 %v317_v29, %v834_v4 }
 0x184   : > { %324 = vrot.lane.b32.xlu0 %v322_v30, %s768_s10 }
 0x188   : > { %v428_v32 = vpop.permute.xlu0 %427 }
 0x189   : > { %v430_v38 = vsel %vm224_vm0, %v425_v31, %v428_v32 }
 0x18a   : > { %v435_v41 = vmul.f32 %v430_v38, %v834_v4 }
 0x18c   : > { %527 = vrot.lane.b32.xlu0 %v828_v2, %s770_s12  ;;  %437 = vrot.lane.b32.xlu2 %v435_v41, %s771_s13 }
 0x190   : > { %v408_v36 = vpop.permute.xlu0 %407 }
 0x191   : > { %v413_v56 = vsel %vm224_vm0, %v408_v36, %v411_v54 }
 0x192   : > { %v418_v57 = vmul.f32 %v413_v56, %v834_v4 }
 0x194   : > { %533 = vrot.lane.b32.xlu0 %v531_v37, %s770_s12  ;;  %414 = vrot.lane.b32.xlu2 %v828_v2, %s773_s16 }
 0x198   : > { %v507_v40 = vpop.permute.xlu0 %506 }
 0x199   : > { %v509_v42 = vsel %vm224_vm0, %v504_v39, %v507_v40 }
 0x19a   : > { %v514_v62 = vmul.f32 %v509_v42, %v834_v4  ;;  %v900_v4 = vpack.c.bf16 %v820_v0, %v820_v0 }
 0x19c   : > { %510 = vrot.lane.b32.xlu0 %v828_v2, %s772_s14  ;;  %420 = vrot.lane.b32.xlu2 %v418_v57, %s773_s16 }
 0x1a0   : > { %v342_v45 = vpop.permute.xlu0 %341 }
 0x1a1   : > { %v344_v46 = vadd.f32 %v342_v45, %v338_v44 }
 0x1a3   : > { %v347_v47 = vpack.c.bf16 %v344_v46, %v344_v46 }
 0x1a5   : > { %352 = vrot.lane.b32.xlu0 %v347_v47, %s774_s18 }
 0x1e6   : > { %v438_v7 = vpop.permute.xlu2 %437 }
 0x1e7   : > { %v440_v9 = vadd.f32 %v438_v7, %v434_v8 }
 0x1e9   : > { %v443_v11 = vpack.c.bf16 %v440_v9, %v440_v9 }
 0x1ee   : > { %v415_v12 = vpop.permute.xlu2 %414 }
 0x1ef   : > { %v417_v14 = vmul.f32 %v415_v12, %v820_v0 }
 0x1f6   : > { %v325_v50 = vpop.permute.xlu0 %324  ;;  %v421_v16 = vpop.permute.xlu2 %420 }
 0x1f7   : > { %v327_v51 = vadd.f32 %v325_v50, %v321_v49  ;;  %v423_v17 = vadd.f32 %v421_v16, %v417_v14 }
 0x1f9   : > { %v345_v52 = vmul.f32 0.35355338, %v327_v51  ;;  %v441_v18 = vmul.f32 0.35355338, %v423_v17 }
 0x1fb   : > { %v346_v55 = vpack.c.bf16 %v345_v52, %v345_v52  ;;  %v442_v19 = vpack.c.bf16 %v441_v18, %v441_v18 }
 0x1fd   : > { %349 = vrot.lane.b32.xlu0 %v346_v55, %s775_s22 }
 0x1fe   : > { %v269_v58 = vpop.f32.mrf.mxu0  ;;  %v528_v63 = vpop.permute.xlu0 %527 }
 0x1ff   : > { %v274_v59 = vsel %vm273_vm2, -1e+09, %v269_v58  ;;  %v530_v10 = vmul.f32 %v528_v63, %v820_v0 }
 0x200   : > { %v275_v60 = vsel %vm253_vm1, %v274_v59, -inf }
 0x201   : > { %276 = vmax.xlane.f32.xlu1 %v275_v60 }
 0x205   : > { %289 = vrot.lane.b32.xlu0 %v900_v4, %s777_s24 }
 0x206   : > { %v271_v61 = vpop.f32.mrf.mxu0  ;;  %v534_v1 = vpop.permute.xlu0 %533 }
 0x207   : > { %v536_v13 = vadd.f32 %v534_v1, %v530_v10 }
 0x209   : > { %v539_v15 = vpack.c.bf16 %v536_v13, %v536_v13 }
 0x20d   : > { %544 = vrot.lane.b32.xlu0 %v539_v15, %s778_s25 }
 0x20e   : > { %v511_v2 = vpop.permute.xlu0 %510 }
 0x20f   : > { %v513_v26 = vmul.f32 %v511_v2, %v820_v0 }
 0x217   : > { %v353_v3 = vpop.permute.xlu0 %352 }
 0x218   : > { %v358_v5 = vsel %vm253_vm1, %v353_v3, 0 }
 0x219   : > { %367 = vmatpush.bf16.xpose.msra.mxu2 %v358_v5 }
 0x21a   : > { %516 = vrot.lane.b32.xlu1 %v514_v62, %s772_s14 }
 0x222   : > { %448 = vrot.lane.b32.xlu1 %v443_v11, %s776_s23 }
 0x22a   : > { %445 = vrot.lane.b32.xlu1 %v442_v19, %s779_s26 }
 0x26f   : > { %v350_v20 = vpop.permute.xlu0 %349 }
 0x270   : > { %693 = vmatmul.msk.bf16.vlgmr.msra.gmra.mxu2 %vm253_vm1, %v350_v20 }
 0x274   : > { %v277_v21 = vpop.xlane.xlu1 %276 }
 0x275   : > { %v278_v22 = vsub.f32 %v274_v59, %v277_v21 }
 0x277   : > { %v279_v23 = vmul.f32 1.442695, %v278_v22  ;;  %v290_v31 = vpop.permute.xlu0 %289 }
 0x278   : > { %v296_v33 = vsel %vm294_vm3, %v290_v31, 0 }
 0x279   : > { %733 = vpow2.f32 %v279_v23  ;;  %305 = vmatpush.bf16.msra.mxu1 %v296_v33 }
 0x27f   : > { %v734_v24 = vpop.eup %733  ;;  %v545_v35 = vpop.permute.xlu0 %544 }
 0x280   : > { %v281_v25 = vsel %vm253_vm1, %v734_v24, 0.0  ;;  %v550_v36 = vsel %vm253_vm1, %v545_v35, 0 }
 0x281   : > { %282 = vadd.xlane.f32.xlu2 %v281_v25  ;;  %559 = vmatpush.bf16.xpose.msrb.mxu0 %v550_v36 }
 0x28c   : > { %v517_v27 = vpop.permute.xlu1 %516 }
 0x28d   : > { %v519_v28 = vadd.f32 %v517_v27, %v513_v26 }
 0x28f   : > { %v537_v29 = vmul.f32 0.35355338, %v519_v28 }
 0x291   : > { %v538_v30 = vpack.c.bf16 %v537_v29, %v537_v29 }
 0x293   : > { %541 = vrot.lane.b32.xlu0 %v538_v30, %s780_s27 }
 0x294   : > { %v449_v32 = vpop.permute.xlu1 %448 }
 0x295   : > { %v454_v34 = vsel %vm253_vm1, %v449_v32, 0 }
 0x296   : > { %463 = vmatpush.bf16.xpose.msrb.mxu1 %v454_v34 }
 0x29c   : > { %v446_v45 = vpop.permute.xlu1 %445 }
 0x2f3   : > { %v369_v0 = vpop.f32.mrf.mxu2 }
 0x2f4   : > { %v283_v37 = vpop.xlane.xlu2 %282  ;;  %v373_v38 = vsel %vm273_vm2, -1e+09, %v369_v0 }
 0x2f5   : > { %735 = vrcp.f32 %v283_v37  ;;  %v374_v39 = vsel %vm253_vm1, %v373_v38, -inf }
 0x2f6   : > { %375 = vmax.xlane.f32.xlu1 %v374_v39 }
 0x2fb   : > { %v736_v40 = vpop.eup %735  ;;  %v371_v41 = vpop.f32.mrf.mxu2 }
 0x2fc   : > { %v285_v42 = vmul.f32 %v736_v40, %v734_v24 }
 0x2fe   : > { %v286_v43 = vpack.c.bf16 %v285_v42, %v285_v42 }
 0x300   : > { %692 = vmatmul.msk.bf16.vlgmr.msra.gmra.mxu1 %vm253_vm1, %v286_v43 }
 0x305   : > { %v542_v44 = vpop.permute.xlu0 %541 }
 0x306   : > { %697 = vmatmul.msk.bf16.vlgmr.msrb.gmra.mxu0 %vm253_vm1, %v542_v44 }
 0x310   : > { %695 = vmatmul.msk.bf16.vlgmr.msrb.gmra.mxu1 %vm253_vm1, %v446_v45 }
 0x369   : > { %v376_v46 = vpop.xlane.xlu1 %375 }
 0x36a   : > { %v377_v47 = vsub.f32 %v373_v38, %v376_v46 }
 0x36c   : > { %v378_v49 = vmul.f32 1.442695, %v377_v47 }
 0x36e   : > { %737 = vpow2.f32 %v378_v49 }
 0x374   : > { %v738_v55 = vpop.eup %737 }
 0x375   : > { %v380_v58 = vsel %vm253_vm1, %v738_v55, 0.0 }
 0x37d   : > { %v916_v48 = vpop.f32.mrf.mxu1 }
 0x383   : > { %v561_v50 = vpop.f32.mrf.mxu0 }
 0x384   : > { %v565_v51 = vsel %vm273_vm2, -1e+09, %v561_v50 }
 0x385   : > { %v309_v52 = vpop.f32.mrf.mxu1  ;;  %v566_v54 = vsel %vm253_vm1, %v565_v51, -inf }
 0x386   : > { %567 = vmax.xlane.f32.xlu2 %v566_v54 }
 0x38b   : > { %v563_v56 = vpop.f32.mrf.mxu0 }
 0x38d   : > { %v465_v57 = vpop.f32.mrf.mxu1 }
 0x38e   : > { %v469_v59 = vsel %vm273_vm2, -1e+09, %v465_v57  ;;  %381 = vadd.xlane.f32.xlu2 %v380_v58 }
 0x38f   : > { %v470_v60 = vsel %vm253_vm1, %v469_v59, -inf }
 0x390   : > { %471 = vmax.xlane.f32.xlu0 %v470_v60 }
 0x395   : > { %v467_v61 = vpop.f32.mrf.mxu1 }
 0x3a4   : > { %482 = vrot.lane.b32.xlu0 %v900_v4, %s771_s13 }
 0x3a6   : > { %386 = vrot.lane.b32.xlu2 %v900_v4, %s770_s12 }
 0x3f9   : > { %v568_v62 = vpop.xlane.xlu2 %567 }
 0x3fa   : > { %v569_v63 = vsub.f32 %v565_v51, %v568_v62 }
 0x3fc   : > { %v570_v1 = vmul.f32 1.442695, %v569_v63 }
 0x3fe   : > { %739 = vpow2.f32 %v570_v1 }
 0x401   : > { %v382_v2 = vpop.xlane.xlu2 %381 }
 0x402   : > { %741 = vrcp.f32 %v382_v2 }
 0x403   : > { %v472_v3 = vpop.xlane.xlu0 %471 }
 0x404   : > { %v740_v53 = vpop.eup %739  ;;  %v473_v5 = vsub.f32 %v469_v59, %v472_v3 }
 0x405   : > { %v572_v6 = vsel %vm253_vm1, %v740_v53, 0.0 }
 0x406   : > { %v474_v7 = vmul.f32 1.442695, %v473_v5  ;;  %573 = vadd.xlane.f32.xlu2 %v572_v6 }
 0x408   : > { %v742_v8 = vpop.eup %741  ;;  %743 = vpow2.f32 %v474_v7 }
 0x409   : > { %v387_v9 = vpop.permute.xlu2 %386  ;;  %v384_v10 = vmul.f32 %v742_v8, %v738_v55 }
 0x40a   : > { %v392_v11 = vsel %vm294_vm3, %v387_v9, 0 }
 0x40b   : > { %401 = vmatpush.bf16.msra.mxu3 %v392_v11  ;;  %v385_v12 = vpack.c.bf16 %v384_v10, %v384_v10 }
 0x40e   : > { %v744_v13 = vpop.eup %743  ;;  %694 = vmatmul.msk.bf16.vlgmr.msra.gmra.mxu3 %vm253_vm1, %v385_v12 }
 0x40f   : > { %v476_v14 = vsel %vm253_vm1, %v744_v13, 0.0 }
 0x410   : > { %477 = vadd.xlane.f32.xlu1 %v476_v14 }
 0x416   : > { %v483_v15 = vpop.permute.xlu0 %482 }
 0x417   : > { %v488_v16 = vsel %vm294_vm3, %v483_v15, 0 }
 0x418   : > { %497 = vmatpush.bf16.msrb.mxu3 %v488_v16 }
 0x429   : > { %578 = vrot.lane.b32.xlu1 %v900_v4, %s767_s9 }
 0x479   : > { %v574_v21 = vpop.xlane.xlu2 %573 }
 0x483   : > { %v478_v17 = vpop.xlane.xlu1 %477 }
 0x484   : > { %745 = vrcp.f32 %v478_v17 }
 0x485   : > { %747 = vrcp.f32 %v574_v21 }
 0x48a   : > { %v746_v18 = vpop.eup %745 }
 0x48b   : > { %v480_v19 = vmul.f32 %v746_v18, %v744_v13  ;;  %v748_v23 = vpop.eup %747 }
 0x48c   : > { %v576_v25 = vmul.f32 %v748_v23, %v740_v53 }
 0x48d   : > { %v481_v20 = vpack.c.bf16 %v480_v19, %v480_v19 }
 0x48e   : > { %v577_v27 = vpack.c.bf16 %v576_v25, %v576_v25 }
 0x48f   : > { %696 = vmatmul.msk.bf16.vlgmr.msrb.gmra.mxu3 %vm253_vm1, %v481_v20 }
 0x491   : > { %v403_v22 = vpop.f32.mrf.mxu3 }
 0x492   : > { %600 = vrot.lane.b32.xlu0 %v403_v22, %s768_s10 }
 0x499   : > { %v405_v24 = vpop.f32.mrf.mxu3 }
 0x49b   : > { %v579_v4 = vpop.permute.xlu1 %578 }
 0x49c   : > { %v584_v26 = vsel %vm294_vm3, %v579_v4, 0 }
 0x49d   : > { %593 = vmatpush.bf16.msrb.mxu2 %v584_v26 }
 0x4a0   : > { %698 = vmatmul.msk.bf16.vlgmr.msrb.gmra.mxu2 %vm253_vm1, %v577_v27 }
 0x504   : > { %v601_v32 = vpop.permute.xlu0 %600 }
 0x505   : > { %v611_v34 = vsel %vm253_vm1, %v916_v48, %v601_v32 }
 0x512   : > { %v499_v28 = vpop.f32.mrf.mxu3 }
 0x513   : > { %604 = vrot.lane.b32.xlu0 %v499_v28, %s773_s16 }
 0x51a   : > { %v501_v29 = vpop.f32.mrf.mxu3 }
 0x523   : > { %v595_v30 = vpop.f32.mrf.mxu2 }
 0x524   : > { %608 = vrot.lane.b32.xlu1 %v595_v30, %s772_s14 }
 0x52b   : > { %v597_v31 = vpop.f32.mrf.mxu2 }
 0x585   : > { %v605_v33 = vpop.permute.xlu0 %604 }
 0x586   : > { %v613_v35 = vsel %vm612_vm4, %v611_v34, %v605_v33 }
 0x596   : > { %v609_v36 = vpop.permute.xlu1 %608 }
 0x597   : > { %v615_v0 = vsel %vm614_vm5, %v613_v35, %v609_v36 }
 0x598   : > { %617 = vst.msk [vmem:[%s209_s30] sm:$0xff] %vm616_vm6, %v615_v0 }
 0x599 PF: > { %s14_s15 = sadd.s32 1, %s755_s15  }
 0x59a   : > { %p11_p4 = scmp.ge.s32.totalorder %s14_s15, 4  }
 0x59c   :  { %13 = sbr.rel (!%p11_p4) target bundleno = 1 (0x1), region = 69 }

// kernel: decoder_forward.23
= control target key start
LH: loop header
LB: loop body
LE: loop exit
PB: predicated region body
PF: predicated region fallthrough
CT: control target
= control target key end

     0   :  { %vm38_vm0 = vcmask 261120   ;;  %vm56_vm1 = vcmask 523264   ;;  %s116_s1 = inlined_call_operand.vmem [shape: bf16[32,64], index: 1, kind: input, shape index: {}]   ;;  %s117_s0 = inlined_call_operand.vmem [shape: f32[16,32], index: 0, kind: input, shape index: {}]   ;;  %s118_s2 = inlined_call_operand.vmem [shape: f32[1,64], index: 2, kind: input, shape index: {}]   ;;  %s119_s3 = inlined_call_operand.vmem [shape: f32[16,64], index: 3, kind: output, shape index: {}]  }
   0x1   :  { %v73_v0 = vld [vmem:[%s116_s1 + $0x8] sm:$0xff]  ;;  %v72_v1 = vld [vmem:[%s116_s1] sm:$0xff] }
   0x2   :  { %48 = vmatpush.bf16.msra.mxu0 %v73_v0  ;;  %v15_v2 = vld [vmem:[%s117_s0] sm:$0xff]  ;;  %v16_v3 = vld [vmem:[%s117_s0 + $0x8] sm:$0xff] }
   0x3   :  { %v17_v4 = vpack.c.bf16 %v16_v3, %v15_v2  ;;  %v74_v5 = vld [vmem:[%s118_s2] ss:$0 sm:$0xff] }
   0x6   :  { %49 = vmatpush.bf16.msra.mxu0 %v72_v1 }
   0x9   :  { %71 = vmatmul.msk.bf16.vlgmr.msra.gmra.mxu0 %vm38_vm0, %v17_v4 }
  0x86   :  { %v51_v6 = vpop.f32.mrf.mxu0 }
  0x87   :  { %v52_v7 = vadd.f32 %v74_v5, %v51_v6 }
  0x89   :  { %57 = vst.msk [vmem:[%s119_s3] sm:$0xff] %vm56_vm1, %v52_v7 }
  0x8e   :  { %v53_v8 = vpop.f32.mrf.mxu0 }
  0x8f   :  { %v54_v9 = vadd.f32 %v74_v5, %v53_v8 }
  0x91   :  { %58 = vst.msk [vmem:[%s119_s3 + $0x8] sm:$0xff] %vm56_vm1, %v54_v9 }

// kernel: decoder_forward.26
= control target key start
LH: loop header
LB: loop body
LE: loop exit
PB: predicated region body
PF: predicated region fallthrough
CT: control target
= control target key end

     0   :  { %vm23_vm0 = vcmask 261120   ;;  %v175_v4 = vmov 32.0   ;;  %v176_v24 = vmov 31.0   ;;  %vm140_vm7 = vcmask 523264   ;;  %s239_s0 = inlined_call_operand.vmem [shape: f32[16,32], index: 0, kind: input, shape index: {}]   ;;  %s240_s1 = inlined_call_operand.vmem [shape: f32[1,32], index: 1, kind: input, shape index: {}]   ;;  %s241_s2 = inlined_call_operand.vmem [shape: f32[1,32], index: 2, kind: input, shape index: {}]   ;;  %s242_s4 = inlined_call_operand.vmem [shape: f32[1,64], index: 4, kind: input, shape index: {}]   ;;  %s243_s3 = inlined_call_operand.vmem [shape: bf16[32,64], index: 3, kind: input, shape index: {}]   ;;  %s244_s5 = inlined_call_operand.vmem [shape: f32[16,64], index: 5, kind: output, shape index: {}]  }
   0x1   :  { %v21_v0 = vld [vmem:[%s239_s0] sm:$0xff]  ;;  %v22_v2 = vld [vmem:[%s239_s0 + $0x8] sm:$0xff]  ;;  %163 = vrcp.f32 %v175_v4 }
   0x2   :  { %v24_v1 = vsel %vm23_vm0, %v21_v0, 0.0  ;;  %v27_v3 = vsel %vm23_vm0, %v22_v2, 0.0  ;;  %v160_v12 = vld [vmem:[%s240_s1] ss:$0 sm:$0xff]  ;;  %165 = vrcp.f32 %v176_v24  ;;  %v157_v28 = vld [vmem:[%s243_s3 + $0x8] sm:$0xff] }
   0x3   :  { %25 = vadd.xlane.f32.xlu0 %v24_v1  ;;  %130 = vmatpush.bf16.msra.mxu0 %v157_v28  ;;  %v156_v30 = vld [vmem:[%s243_s3] sm:$0xff] }
   0x4   :  { %v161_v61 = vld [vmem:[%s241_s2] ss:$0 sm:$0xff] }
   0x7   :  { %v164_v5 = vpop.eup %163  ;;  %131 = vmatpush.bf16.msra.mxu0 %v156_v30 }
   0x8   :  { %v31_v6 = vmul.f32 32.0, %v164_v5  ;;  %vm35_vm1 = vweird.f32 %v164_v5  ;;  %v166_v25 = vpop.eup %165 }
   0x9   :  { %v50_v26 = vmul.f32 31.0, %v166_v25  ;;  %vm54_vm2 = vweird.f32 %v166_v25 }
   0xa   :  { %v32_v7 = vsub.f32 1.0, %v31_v6 }
   0xb   :  { %28 = vadd.xlane.f32.xlu0 %v27_v3  ;;  %v51_v27 = vsub.f32 1.0, %v50_v26  ;;  %v162_v3 = vld [vmem:[%s242_s4] ss:$0 sm:$0xff] }
   0xc   :  { %v33_v8 = vmul.f32 %v164_v5, %v32_v7 }
   0xd   :  { %v52_v29 = vmul.f32 %v166_v25, %v51_v27 }
   0xe   :  { %v34_v9 = vadd.f32 %v164_v5, %v33_v8 }
   0xf   :  { %v53_v31 = vadd.f32 %v166_v25, %v52_v29 }
  0x10   :  { %v36_v10 = vsel %vm35_vm1, %v164_v5, %v34_v9 }
  0x11   :  { %v55_v32 = vsel %vm54_vm2, %v166_v25, %v53_v31 }
  0x76   :  { %v26_v11 = vpop.xlane.xlu0 %25 }
  0x77   :  { %v37_v13 = vmul.f32 %v36_v10, %v26_v11 }
  0x79   :  { %v39_v14 = vsub.f32 %v21_v0, %v37_v13 }
  0x7b   :  { %v86_v15 = vmul.f32 %v160_v12, %v39_v14  ;;  %v41_v16 = vmul.f32 %v39_v14, %v39_v14 }
  0x7d   :  { %v43_v17 = vsel %vm23_vm0, %v41_v16, 0.0 }
  0x7e   :  { %44 = vadd.xlane.f32.xlu1 %v43_v17  ;;  %v29_v18 = vpop.xlane.xlu0 %28 }
  0x7f   :  { %v38_v19 = vmul.f32 %v36_v10, %v29_v18 }
  0x81   :  { %v40_v20 = vsub.f32 %v22_v2, %v38_v19 }
  0x83   :  { %v87_v21 = vmul.f32 %v160_v12, %v40_v20  ;;  %v42_v22 = vmul.f32 %v40_v20, %v40_v20 }
  0x85   :  { %v46_v23 = vsel %vm23_vm0, %v42_v22, 0.0 }
  0x86   :  { %47 = vadd.xlane.f32.xlu1 %v46_v23 }
  0xf1   :  { %v45_v33 = vpop.xlane.xlu1 %44 }
  0xf2   :  { %v56_v34 = vmul.f32 %v55_v32, %v45_v33 }
  0xf4   :  { %167 = vrsqrt.f32 %v56_v34  ;;  %vm65_vm3 = vcmp.eq.f32.partialorder %v56_v34, inf  ;;  %v68_v47 = vand.u32 2147483648, %v56_v34  ;;  %vm67_vm4 = vcmp.eq.f32.partialorder %v56_v34, 0.0 }
  0xf9   :  { %v48_v35 = vpop.xlane.xlu1 %47 }
  0xfa   :  { %v168_v36 = vpop.eup %167  ;;  %v57_v37 = vmul.f32 %v55_v32, %v48_v35 }
  0xfb   :  { %v59_v38 = vmul.f32 %v168_v36, %v56_v34 }
  0xfc   :  { %169 = vrsqrt.f32 %v57_v37  ;;  %vm77_vm5 = vcmp.eq.f32.partialorder %v57_v37, inf  ;;  %v80_v55 = vand.u32 2147483648, %v57_v37  ;;  %vm79_vm6 = vcmp.eq.f32.partialorder %v57_v37, 0.0 }
  0xfd   :  { %v60_v39 = vmul.f32 %v168_v36, %v59_v38 }
  0xff   :  { %v61_v40 = vmul.f32 0.5, %v60_v39 }
 0x101   :  { %v62_v41 = vsub.f32 1.5, %v61_v40 }
 0x102   :  { %v170_v42 = vpop.eup %169 }
 0x103   :  { %v71_v43 = vmul.f32 %v170_v42, %v57_v37  ;;  %v63_v44 = vmul.f32 %v168_v36, %v62_v41 }
 0x105   :  { %v72_v45 = vmul.f32 %v170_v42, %v71_v43  ;;  %v64_v46 = vmul.f32 %v63_v44, %v56_v34 }
 0x107   :  { %v66_v48 = vsel %vm65_vm3, %v56_v34, %v64_v46  ;;  %v73_v49 = vmul.f32 0.5, %v72_v45 }
 0x108   :  { %v69_v50 = vsel %vm67_vm4, %v68_v47, %v66_v48 }
 0x109   :  { %v74_v51 = vsub.f32 1.5, %v73_v49  ;;  %v88_v53 = vadd.f32 1e-06, %v69_v50 }
 0x10b   :  { %v75_v52 = vmul.f32 %v170_v42, %v74_v51  ;;  %171 = vrcp.f32 %v88_v53 }
 0x10d   :  { %v76_v54 = vmul.f32 %v75_v52, %v57_v37 }
 0x10f   :  { %v78_v56 = vsel %vm77_vm5, %v57_v37, %v76_v54 }
 0x110   :  { %v81_v57 = vsel %vm79_vm6, %v80_v55, %v78_v56 }
 0x111   :  { %v89_v58 = vadd.f32 1e-06, %v81_v57  ;;  %v172_v59 = vpop.eup %171 }
 0x112   :  { %v92_v60 = vmul.f32 %v172_v59, %v86_v15 }
 0x113   :  { %173 = vrcp.f32 %v89_v58 }
 0x114   :  { %v98_v0 = vadd.f32 %v161_v61, %v92_v60 }
 0x119   :  { %v174_v62 = vpop.eup %173 }
 0x11a   :  { %v93_v63 = vmul.f32 %v174_v62, %v87_v21 }
 0x11c   :  { %v99_v1 = vadd.f32 %v161_v61, %v93_v63 }
 0x11e   :  { %v100_v2 = vpack.c.bf16 %v99_v1, %v98_v0 }
 0x120   :  { %155 = vmatmul.msk.bf16.vlgmr.msra.gmra.mxu0 %vm23_vm0, %v100_v2 }
 0x19d   :  { %v133_v4 = vpop.f32.mrf.mxu0 }
 0x19e   :  { %v134_v5 = vadd.f32 %v162_v3, %v133_v4 }
 0x1a0   :  { %v138_v6 = vmax.f32 %v134_v5, 0.0 }
 0x1a2   :  { %141 = vst.msk [vmem:[%s244_s5] sm:$0xff] %vm140_vm7, %v138_v6 }
 0x1a5   :  { %v135_v7 = vpop.f32.mrf.mxu0 }
 0x1a6   :  { %v136_v8 = vadd.f32 %v162_v3, %v135_v7 }
 0x1a8   :  { %v139_v9 = vmax.f32 %v136_v8, 0.0 }
 0x1aa   :  { %142 = vst.msk [vmem:[%s244_s5 + $0x8] sm:$0xff] %vm140_vm7, %v139_v9 }

// kernel: decoder_forward.24
= control target key start
LH: loop header
LB: loop body
LE: loop exit
PB: predicated region body
PF: predicated region fallthrough
CT: control target
= control target key end

     0   :  { %s623_s12 = smov 0   ;;  %s694_s0 = inlined_call_operand.vmem [shape: f32[2,8,32], index: 0, kind: input, shape index: {}]   ;;  %s695_s1 = inlined_call_operand.vmem [shape: f32[2,8,64], index: 1, kind: input, shape index: {}]   ;;  %s696_s2 = inlined_call_operand.vmem [shape: f32[2,8,8], index: 2, kind: input, shape index: {}]   ;;  %s697_s3 = inlined_call_operand.vmem [shape: f32[2,8,32], index: 3, kind: output, shape index: {}]  }
   0x1 LB: > { %s532_s13 = sadd.s32 4294967295, %s591_s12   ;;  %p536_p0 = scmp.ge.s32.totalorder %s591_s12, 1  ;;  %s591_s12 = sphi %s623_s12, %s13_s12  }
   0x2   : > { %p154_p1 = scmp.lt.s32.totalorder %s591_s12, 3 }
   0x4   : > { %p155_p2 = pnand %p536_p0, %p154_p1 }
   0x5   : > { %p184_p3 = scmp.lt.s32.totalorder (!%p155_p2), %s532_s13, 1  ;;  %s593_s21 = smov (!%p155_p2), 96  }
   0x6   : > { %158 = sbr.rel (%p155_p2) target bundleno = 1076 (0x434), region = 32  ;;  %s594_s22 = smov (!%p155_p2), 112  }
   0x7   : > { %s595_s23 = smov (!%p155_p2), 104   ;;  %s596_s27 = smov (!%p155_p2), 120  }
   0x8   : > { %s597_s28 = smov (!%p155_p2), 88   ;;  %s598_s29 = smov (!%p155_p2), 80  }
   0x9   : > { %s599_s30 = smov (!%p155_p2), 72   ;;  %s600_s4 = smov (!%p155_p2), 8  }
   0xa   : > { %s601_s5 = smov (!%p155_p2), 24   ;;  %s602_s6 = smov (!%p155_p2), 16  }
   0xb   : > { %s699_s13 = smov (!%p184_p3, %s532_s13), 1  ;;  %vm207_vm0 = vcmask 64512   ;;  %vm247_vm2 = vcmask 1043456   ;;  %vm449_vm3 = vcmask 130048   ;;  %vm451_vm4 = vcmask 195584  }
   0xc   : > { %s631_s14 = sshll.u32 %s699_s13, 3  ;;  %vm453_vm5 = vcmask 261120  }
   0xd   : > { %s191_s17 = scalar_lea.vmem %s695_s1, %s631_s14  ;;  %s187_s20 = scalar_lea.vmem %s694_s0, %s631_s14 }
   0xe   : > { %v202_v0 = vld [vmem:[%s191_s17] sm:$0xff]  ;;  %s195_s26 = scalar_lea.vmem %s696_s2, %s631_s14  ;;  %s199_s9 = scalar_lea.vmem %s697_s3, %s631_s14 }
   0xf   : > { %v201_v1 = vld [vmem:[%s187_s20] sm:$0xff]  ;;  %v641_v2 = vpack.c.bf16 %v202_v0, %v202_v0 }
  0x10   : > { %v204_v4 = vmul.f32 0.35355338, %v201_v1  ;;  %v203_v6 = vld [vmem:[%s195_s26] sm:$0xff] }
  0x11   : > { %v212_v3 = vsel %vm207_vm0, %v641_v2, 0  ;;  %242 = vrot.lane.b32.xlu2 %v641_v2, %s593_s21  ;;  %vm227_vm1 = vcmp.eq.f32.partialorder %v203_v6, 0.0 }
  0x12   : > { %221 = vmatpush.bf16.xpose.msra.mxu0 %v212_v3  ;;  %v205_v5 = vpack.c.bf16 %v204_v4, %v204_v4 }
  0x19   : > { %541 = vmatmul.msk.bf16.vlgmr.msra.gmra.mxu0 %vm207_vm0, %v205_v5  ;;  %324 = vrot.lane.b32.xlu2 %v641_v2, %s594_s22 }
  0x21   : > { %381 = vrot.lane.b32.xlu2 %v641_v2, %s595_s23 }
  0x29   : > { %322 = vrot.lane.b32.xlu2 %v205_v5, %s594_s22 }
  0x6b   : > { %v243_v11 = vpop.permute.xlu2 %242 }
  0x6c   : > { %v249_v22 = vsel %vm247_vm2, %v243_v11, 0 }
  0x6d   : > { %258 = vmatpush.bf16.msra.mxu1 %v249_v22 }
  0x73   : > { %v325_v12 = vpop.permute.xlu2 %324 }
  0x74   : > { %v330_v23 = vsel %vm207_vm0, %v325_v12, 0 }
  0x75   : > { %339 = vmatpush.bf16.xpose.msrb.mxu1 %v330_v23 }
  0x7b   : > { %v382_v16 = vpop.permute.xlu2 %381 }
  0x7c   : > { %v387_v17 = vsel %vm207_vm0, %v382_v16, 0 }
  0x7d   : > { %396 = vmatpush.bf16.xpose.msrb.mxu0 %v387_v17 }
  0x83   : > { %v323_v30 = vpop.permute.xlu2 %322 }
  0x96   : > { %v223_v7 = vpop.f32.mrf.mxu0 }
  0x97   : > { %v228_v8 = vsel %vm227_vm1, -1e+09, %v223_v7 }
  0x98   : > { %v229_v9 = vsel %vm207_vm0, %v228_v8, -inf }
  0x99   : > { %230 = vmax.xlane.f32.xlu0 %v229_v9 }
  0x9e   : > { %v225_v10 = vpop.f32.mrf.mxu0 }
  0xad   : > { %267 = vrot.lane.b32.xlu0 %v641_v2, %s596_s27 }
  0xb5   : > { %379 = vrot.lane.b32.xlu0 %v205_v5, %s595_s23 }
 0x10c   : > { %v231_v13 = vpop.xlane.xlu0 %230 }
 0x10d   : > { %v232_v14 = vsub.f32 %v228_v8, %v231_v13 }
 0x10f   : > { %v233_v15 = vmul.f32 1.442695, %v232_v14 }
 0x111   : > { %569 = vpow2.f32 %v233_v15 }
 0x117   : > { %v570_v18 = vpop.eup %569 }
 0x118   : > { %v235_v19 = vsel %vm207_vm0, %v570_v18, 0.0 }
 0x119   : > { %236 = vadd.xlane.f32.xlu1 %v235_v19 }
 0x11f   : > { %v268_v20 = vpop.permute.xlu0 %267 }
 0x120   : > { %v273_v24 = vsel %vm207_vm0, %v268_v20, 0 }
 0x121   : > { %282 = vmatpush.bf16.xpose.msra.mxu2 %v273_v24 }
 0x127   : > { %v380_v21 = vpop.permute.xlu0 %379 }
 0x128   : > { %547 = vmatmul.msk.bf16.vlgmr.msrb.gmra.mxu0 %vm207_vm0, %v380_v21 }
 0x132   : > { %265 = vrot.lane.b32.xlu1 %v205_v5, %s596_s27 }
 0x18c   : > { %v237_v25 = vpop.xlane.xlu1 %236 }
 0x18d   : > { %571 = vrcp.f32 %v237_v25 }
 0x193   : > { %v572_v26 = vpop.eup %571 }
 0x194   : > { %v239_v27 = vmul.f32 %v572_v26, %v570_v18 }
 0x196   : > { %v240_v28 = vpack.c.bf16 %v239_v27, %v239_v27 }
 0x198   : > { %542 = vmatmul.msk.bf16.vlgmr.msra.gmra.mxu1 %vm207_vm0, %v240_v28 }
 0x1a4   : > { %v266_v29 = vpop.permute.xlu1 %265 }
 0x1a5   : > { %543 = vmatmul.msk.bf16.vlgmr.msra.gmra.mxu2 %vm207_vm0, %v266_v29  ;;  %v398_v31 = vpop.f32.mrf.mxu0 }
 0x1a6   : > { %v402_v32 = vsel %vm227_vm1, -1e+09, %v398_v31 }
 0x1a7   : > { %v403_v33 = vsel %vm207_vm0, %v402_v32, -inf }
 0x1a8   : > { %545 = vmatmul.msk.bf16.vlgmr.msrb.gmra.mxu1 %vm207_vm0, %v323_v30  ;;  %404 = vmax.xlane.f32.xlu0 %v403_v33 }
 0x1ad   : > { %v400_v34 = vpop.f32.mrf.mxu0 }
 0x215   : > { %v667_v35 = vpop.f32.mrf.mxu1 }
 0x21b   : > { %v405_v47 = vpop.xlane.xlu0 %404 }
 0x21c   : > { %v406_v51 = vsub.f32 %v402_v32, %v405_v47 }
 0x21d   : > { %v262_v36 = vpop.f32.mrf.mxu1 }
 0x21e   : > { %v407_v53 = vmul.f32 1.442695, %v406_v51 }
 0x225   : > { %v341_v37 = vpop.f32.mrf.mxu1 }
 0x226   : > { %v345_v38 = vsel %vm227_vm1, -1e+09, %v341_v37 }
 0x227   : > { %v346_v39 = vsel %vm207_vm0, %v345_v38, -inf }
 0x228   : > { %347 = vmax.xlane.f32.xlu1 %v346_v39  ;;  %v284_v40 = vpop.f32.mrf.mxu2 }
 0x229   : > { %v288_v41 = vsel %vm227_vm1, -1e+09, %v284_v40 }
 0x22a   : > { %v289_v42 = vsel %vm207_vm0, %v288_v41, -inf }
 0x22b   : > { %290 = vmax.xlane.f32.xlu2 %v289_v42 }
 0x22d   : > { %v343_v43 = vpop.f32.mrf.mxu1 }
 0x230   : > { %v286_v44 = vpop.f32.mrf.mxu2 }
 0x241   : > { %301 = vrot.lane.b32.xlu1 %v641_v2, %s597_s28 }
 0x29b   : > { %v348_v45 = vpop.xlane.xlu1 %347 }
 0x29c   : > { %v349_v46 = vsub.f32 %v345_v38, %v348_v45 }
 0x29e   : > { %v350_v48 = vmul.f32 1.442695, %v349_v46  ;;  %v291_v49 = vpop.xlane.xlu2 %290 }
 0x29f   : > { %v292_v50 = vsub.f32 %v288_v41, %v291_v49 }
 0x2a0   : > { %573 = vpow2.f32 %v350_v48 }
 0x2a1   : > { %v293_v52 = vmul.f32 1.442695, %v292_v50 }
 0x2a3   : > { %575 = vpow2.f32 %v293_v52 }
 0x2a4   : > { %577 = vpow2.f32 %v407_v53 }
 0x2a6   : > { %v574_v54 = vpop.eup %573 }
 0x2a7   : > { %v352_v55 = vsel %vm207_vm0, %v574_v54, 0.0 }
 0x2a8   : > { %353 = vadd.xlane.f32.xlu0 %v352_v55 }
 0x2a9   : > { %v576_v56 = vpop.eup %575 }
 0x2aa   : > { %v295_v57 = vsel %vm207_vm0, %v576_v56, 0.0  ;;  %v578_v58 = vpop.eup %577 }
 0x2ab   : > { %296 = vadd.xlane.f32.xlu2 %v295_v57  ;;  %v409_v59 = vsel %vm207_vm0, %v578_v58, 0.0 }
 0x2b3   : > { %410 = vadd.xlane.f32.xlu2 %v409_v59  ;;  %v302_v60 = vpop.permute.xlu1 %301 }
 0x2b4   : > { %v307_v61 = vsel %vm247_vm2, %v302_v60, 0 }
 0x2b5   : > { %316 = vmatpush.bf16.msra.mxu3 %v307_v61 }
 0x2bc   : > { %358 = vrot.lane.b32.xlu0 %v641_v2, %s598_s29 }
 0x2cb   : > { %415 = vrot.lane.b32.xlu2 %v641_v2, %s599_s30 }
 0x31b   : > { %v354_v0 = vpop.xlane.xlu0 %353 }
 0x31e   : > { %v297_v62 = vpop.xlane.xlu2 %296 }
 0x31f   : > { %579 = vrcp.f32 %v297_v62 }
 0x325   : > { %v580_v63 = vpop.eup %579 }
 0x326   : > { %v411_v1 = vpop.xlane.xlu2 %410  ;;  %v299_v3 = vmul.f32 %v580_v63, %v576_v56 }
 0x327   : > { %581 = vrcp.f32 %v411_v1 }
 0x328   : > { %v300_v4 = vpack.c.bf16 %v299_v3, %v299_v3  ;;  %583 = vrcp.f32 %v354_v0 }
 0x32a   : > { %544 = vmatmul.msk.bf16.vlgmr.msra.gmra.mxu3 %vm207_vm0, %v300_v4 }
 0x32d   : > { %v582_v5 = vpop.eup %581 }
 0x32e   : > { %v413_v6 = vmul.f32 %v582_v5, %v578_v58  ;;  %v416_v7 = vpop.permute.xlu2 %415  ;;  %v359_v8 = vpop.permute.xlu0 %358 }
 0x32f   : > { %v364_v2 = vsel %vm247_vm2, %v359_v8, 0  ;;  %v421_v9 = vsel %vm247_vm2, %v416_v7, 0  ;;  %v584_v11 = vpop.eup %583 }
 0x330   : > { %373 = vmatpush.bf16.msrb.mxu3 %v364_v2  ;;  %430 = vmatpush.bf16.msrb.mxu2 %v421_v9  ;;  %v414_v10 = vpack.c.bf16 %v413_v6, %v413_v6  ;;  %v356_v12 = vmul.f32 %v584_v11, %v574_v54 }
 0x332   : > { %v357_v13 = vpack.c.bf16 %v356_v12, %v356_v12 }
 0x333   : > { %548 = vmatmul.msk.bf16.vlgmr.msrb.gmra.mxu2 %vm207_vm0, %v414_v10 }
 0x33a   : > { %546 = vmatmul.msk.bf16.vlgmr.msrb.gmra.mxu3 %vm207_vm0, %v357_v13 }
 0x3ad   : > { %v318_v14 = vpop.f32.mrf.mxu3 }
 0x3ae   : > { %437 = vrot.lane.b32.xlu1 %v318_v14, %s600_s4 }
 0x3b5   : > { %v320_v15 = vpop.f32.mrf.mxu3 }
 0x3b6   : > { %v432_v16 = vpop.f32.mrf.mxu2 }
 0x3b7   : > { %445 = vrot.lane.b32.xlu1 %v432_v16, %s601_s5 }
 0x3bd   : > { %v375_v17 = vpop.f32.mrf.mxu3 }
 0x3be   : > { %v434_v18 = vpop.f32.mrf.mxu2  ;;  %441 = vrot.lane.b32.xlu0 %v375_v17, %s602_s6 }
 0x3c5   : > { %v377_v19 = vpop.f32.mrf.mxu3 }
 0x420   : > { %v438_v20 = vpop.permute.xlu1 %437 }
 0x421   : > { %v448_v21 = vsel %vm207_vm0, %v667_v35, %v438_v20 }
 0x429   : > { %v446_v23 = vpop.permute.xlu1 %445 }
 0x430   : > { %v442_v22 = vpop.permute.xlu0 %441 }
 0x431   : > { %v450_v24 = vsel %vm449_vm3, %v448_v21, %v442_v22 }
 0x432   : > { %v452_v25 = vsel %vm451_vm4, %v450_v24, %v446_v23 }
 0x433   : > { %454 = vst.msk [vmem:[%s199_s9] sm:$0xff] %vm453_vm5, %v452_v25 }
 0x434 PF: > { %s13_s12 = sadd.s32 1, %s591_s12  }
 0x435   : > { %p10_p4 = scmp.ge.s32.totalorder %s13_s12, 4  }
 0x437   :  { %12 = sbr.rel (!%p10_p4) target bundleno = 1 (0x1), region = 68 }

// kernel: decoder_forward.27
= control target key start
LH: loop header
LB: loop body
LE: loop exit
PB: predicated region body
PF: predicated region fallthrough
CT: control target
= control target key end

     0   :  { %vm57_vm0 = vcmask 523264   ;;  %vm79_vm1 = vcmask 261120   ;;  %s166_s1 = inlined_call_operand.vmem [shape: bf16[64,32], index: 1, kind: input, shape index: {}]   ;;  %s167_s2 = inlined_call_operand.vmem [shape: f32[1,32], index: 2, kind: input, shape index: {}]   ;;  %s168_s0 = inlined_call_operand.vmem [shape: f32[16,64], index: 0, kind: input, shape index: {}]   ;;  %s169_s3 = inlined_call_operand.vmem [shape: f32[16,32], index: 3, kind: input, shape index: {}]   ;;  %s170_s4 = inlined_call_operand.vmem [shape: f32[16,32], index: 4, kind: output, shape index: {}]  }
   0x1   :  { %v106_v0 = vld [vmem:[%s166_s1 + $0x18] sm:$0xff]  ;;  %v105_v1 = vld [vmem:[%s166_s1 + $0x10] sm:$0xff]  ;;  %v104_v2 = vld [vmem:[%s166_s1 + $0x8] sm:$0xff] }
   0x2   :  { %65 = vmatpush.bf16.msra.mxu0 %v106_v0  ;;  %v103_v3 = vld [vmem:[%s166_s1] sm:$0xff]  ;;  %v19_v5 = vld [vmem:[%s168_s0 + $0x8] sm:$0xff] }
   0x3   :  { %v18_v4 = vld [vmem:[%s168_s0] sm:$0xff]  ;;  %v76_v13 = vld [vmem:[%s169_s3 + $0x8] sm:$0xff] }
   0x4   :  { %v20_v6 = vpack.c.bf16 %v19_v5, %v18_v4  ;;  %v107_v7 = vld [vmem:[%s167_s2] ss:$0 sm:$0xff] }
   0x5   :  { %v75_v9 = vld [vmem:[%s169_s3] sm:$0xff] }
   0x6   :  { %66 = vmatpush.bf16.msra.mxu0 %v105_v1 }
   0xa   :  { %67 = vmatpush.bf16.msra.mxu0 %v104_v2 }
   0xe   :  { %68 = vmatpush.bf16.msra.mxu0 %v103_v3 }
  0x11   :  { %102 = vmatmul.msk.bf16.vlgmr.msra.gmra.mxu0 %vm57_vm0, %v20_v6 }
  0x8e   :  { %v70_v8 = vpop.f32.mrf.mxu0 }
  0x8f   :  { %v71_v10 = vadd.f32 %v107_v7, %v70_v8 }
  0x91   :  { %v77_v11 = vadd.f32 %v75_v9, %v71_v10 }
  0x93   :  { %80 = vst.msk [vmem:[%s170_s4] sm:$0xff] %vm79_vm1, %v77_v11 }
  0x96   :  { %v72_v12 = vpop.f32.mrf.mxu0 }
  0x97   :  { %v73_v14 = vadd.f32 %v107_v7, %v72_v12 }
  0x99   :  { %v78_v15 = vadd.f32 %v76_v13, %v73_v14 }
  0x9b   :  { %81 = vst.msk [vmem:[%s170_s4 + $0x8] sm:$0xff] %vm79_vm1, %v78_v15 }

// kernel: decoder_forward.37
= control target key start
LH: loop header
LB: loop body
LE: loop exit
PB: predicated region body
PF: predicated region fallthrough
CT: control target
= control target key end

     0   :  { %vm17_vm0 = vcmask 261120   ;;  %s205_s0 = inlined_call_operand.vmem [shape: f32[16,32], index: 0, kind: input, shape index: {}]   ;;  %s206_s1 = inlined_call_operand.vmem [shape: f32[1,32], index: 1, kind: input, shape index: {}]   ;;  %s207_s2 = inlined_call_operand.vmem [shape: f32[1,32], index: 2, kind: input, shape index: {}]   ;;  %s208_s3 = inlined_call_operand.hbm [shape: f32[16,32], index: 3, kind: output, shape index: {}]  }
   0x1   :  { %v15_v0 = vld [vmem:[%s205_s0] sm:$0xff] }
   0x2   :  { %v18_v1 = vsel %vm17_vm0, %v15_v0, 0.0 }
   0x3   :  { %8 = vsyncpa [#allocation3], 0  ;;  %19 = vadd.xlane.f32.xlu0 %v18_v1  ;;  %v16_v2 = vld [vmem:[%s205_s0 + $0x8] sm:$0xff]  ;;  %v159_v4 = vmov 32.0   ;;  %v160_v21 = vmov 31.0   ;;  %s102_s22 = sshll.u32 %s208_s3, 4  ;;  %s103_s22 = int_to_ptr.hbm [resolvable:$true] %s102_s22 }
   0x4   :  { %v21_v3 = vsel %vm17_vm0, %v16_v2, 0.0  ;;  %121 = vrcp.f32 %v159_v4  ;;  %v119_v49 = vld [vmem:[%s206_s1] ss:$0 sm:$0xff]  ;;  %s161_s1 = smov [#allocation2]   ;;  %s163_s23 = smov 8  }
   0x5   :  { %123 = vrcp.f32 %v160_v21  ;;  %v120_v55 = vld [vmem:[%s207_s2] ss:$0 sm:$0xff]  ;;  %s100_s19 = sshll.u32 %s161_s1, 4  ;;  %s162_s2 = smov 128   ;;  %s101_s19 = int_to_ptr.vmem [resolvable:$true] %s100_s19 }
   0xa   :  { %v122_v5 = vpop.eup %121 }
   0xb   :  { %22 = vadd.xlane.f32.xlu0 %v21_v3  ;;  %v25_v6 = vmul.f32 32.0, %v122_v5  ;;  %vm29_vm1 = vweird.f32 %v122_v5  ;;  %v124_v22 = vpop.eup %123 }
   0xc   :  { %v44_v23 = vmul.f32 31.0, %v124_v22  ;;  %vm48_vm2 = vweird.f32 %v124_v22 }
   0xd   :  { %v26_v7 = vsub.f32 1.0, %v25_v6 }
   0xe   :  { %v45_v24 = vsub.f32 1.0, %v44_v23 }
   0xf   :  { %v27_v8 = vmul.f32 %v122_v5, %v26_v7 }
  0x10   :  { %v46_v25 = vmul.f32 %v124_v22, %v45_v24 }
  0x11   :  { %v28_v9 = vadd.f32 %v122_v5, %v27_v8 }
  0x12   :  { %v47_v26 = vadd.f32 %v124_v22, %v46_v25 }
  0x13   :  { %v30_v10 = vsel %vm29_vm1, %v122_v5, %v28_v9 }
  0x14   :  { %v49_v27 = vsel %vm48_vm2, %v124_v22, %v47_v26 }
  0x76   :  { %v20_v11 = vpop.xlane.xlu0 %19 }
  0x77   :  { %v31_v12 = vmul.f32 %v30_v10, %v20_v11 }
  0x79   :  { %v33_v13 = vsub.f32 %v15_v0, %v31_v12 }
  0x7b   :  { %v35_v14 = vmul.f32 %v33_v13, %v33_v13  ;;  %v80_v53 = vmul.f32 %v119_v49, %v33_v13 }
  0x7d   :  { %v37_v15 = vsel %vm17_vm0, %v35_v14, 0.0 }
  0x7e   :  { %38 = vadd.xlane.f32.xlu1 %v37_v15  ;;  %v23_v16 = vpop.xlane.xlu0 %22 }
  0x7f   :  { %v32_v17 = vmul.f32 %v30_v10, %v23_v16 }
  0x81   :  { %v34_v18 = vsub.f32 %v16_v2, %v32_v17 }
  0x83   :  { %v36_v19 = vmul.f32 %v34_v18, %v34_v18  ;;  %v81_v60 = vmul.f32 %v119_v49, %v34_v18 }
  0x85   :  { %v40_v20 = vsel %vm17_vm0, %v36_v19, 0.0 }
  0x86   :  { %41 = vadd.xlane.f32.xlu1 %v40_v20 }
  0xf1   :  { %v39_v28 = vpop.xlane.xlu1 %38 }
  0xf2   :  { %v50_v29 = vmul.f32 %v49_v27, %v39_v28 }
  0xf4   :  { %125 = vrsqrt.f32 %v50_v29  ;;  %vm59_vm3 = vcmp.eq.f32.partialorder %v50_v29, inf  ;;  %v62_v42 = vand.u32 2147483648, %v50_v29  ;;  %vm61_vm4 = vcmp.eq.f32.partialorder %v50_v29, 0.0 }
  0xf9   :  { %v42_v30 = vpop.xlane.xlu1 %41 }
  0xfa   :  { %v126_v31 = vpop.eup %125  ;;  %v51_v32 = vmul.f32 %v49_v27, %v42_v30 }
  0xfb   :  { %v53_v33 = vmul.f32 %v126_v31, %v50_v29 }
  0xfc   :  { %127 = vrsqrt.f32 %v51_v32  ;;  %vm71_vm5 = vcmp.eq.f32.partialorder %v51_v32, inf  ;;  %v74_v51 = vand.u32 2147483648, %v51_v32  ;;  %vm73_vm6 = vcmp.eq.f32.partialorder %v51_v32, 0.0 }
  0xfd   :  { %v54_v34 = vmul.f32 %v126_v31, %v53_v33 }
  0xff   :  { %v55_v35 = vmul.f32 0.5, %v54_v34 }
 0x101   :  { %v56_v36 = vsub.f32 1.5, %v55_v35 }
 0x102   :  { %v128_v37 = vpop.eup %127 }
 0x103   :  { %v57_v38 = vmul.f32 %v126_v31, %v56_v36  ;;  %v65_v39 = vmul.f32 %v128_v37, %v51_v32 }
 0x105   :  { %v58_v40 = vmul.f32 %v57_v38, %v50_v29  ;;  %v66_v41 = vmul.f32 %v128_v37, %v65_v39 }
 0x107   :  { %v60_v43 = vsel %vm59_vm3, %v50_v29, %v58_v40  ;;  %v67_v44 = vmul.f32 0.5, %v66_v41 }
 0x108   :  { %v63_v45 = vsel %vm61_vm4, %v62_v42, %v60_v43 }
 0x109   :  { %v68_v46 = vsub.f32 1.5, %v67_v44  ;;  %v82_v47 = vadd.f32 1e-06, %v63_v45 }
 0x10b   :  { %v69_v48 = vmul.f32 %v128_v37, %v68_v46  ;;  %129 = vrcp.f32 %v82_v47 }
 0x10d   :  { %v70_v50 = vmul.f32 %v69_v48, %v51_v32 }
 0x10f   :  { %v72_v52 = vsel %vm71_vm5, %v51_v32, %v70_v50 }
 0x110   :  { %v75_v54 = vsel %vm73_vm6, %v74_v51, %v72_v52 }
 0x111   :  { %v130_v56 = vpop.eup %129  ;;  %v83_v57 = vadd.f32 1e-06, %v75_v54 }
 0x112   :  { %v86_v58 = vmul.f32 %v130_v56, %v80_v53 }
 0x113   :  { %131 = vrcp.f32 %v83_v57 }
 0x114   :  { %v92_v59 = vadd.f32 %v120_v55, %v86_v58 }
 0x116   :  { %94 = vst.msk [vmem:[#allocation2] sm:$0xff] %vm17_vm0, %v92_v59 }
 0x119   :  { %v132_v61 = vpop.eup %131 }
 0x11a   :  { %v87_v62 = vmul.f32 %v132_v61, %v81_v60 }
 0x11c   :  { %v93_v63 = vadd.f32 %v120_v55, %v87_v62 }
 0x11e   :  { %95 = vst.msk [vmem:[#allocation2 + $0x8] sm:$0xff] %vm17_vm0, %v93_v63 }
 0x11f   :  { %108 = dma.vmem_to_hbm [thread:$0]  %s101_s19, 256, %s103_s22, [#allocation3], %s162_s2, %s162_s2, %s163_s23  }
 0x120   :  { %157 = dma.done.wait [#allocation3], 256  }
 0x121   :  { %158 = vsyncadd [#allocation3], 4294967040 }
 0x122   :  { %113 = vsyncpa [#allocation3], 1 }

</bundles_post_ra>
